<compile_context>
chip_gen: v6e
topology: v6e:2x2x1
jax: 0.10.0
libtpu: 0.0.40
codegen_flags: <defaults>
</compile_context>

<pallas_src>
import jax
import jax.numpy as jnp
from jax.experimental import pallas as pl
from jax.experimental.pallas import tpu as pltpu  # noqa: F401  (TPU backend extensions)

# ---------------- model config (small, consistent with the module) ----------------
N_HEAD  = 2
D_MODEL = 32
D_HEAD  = 16
D_INNER = 64
QLEN    = 16                # qlen == klen == rlen (no memory)
RLEN    = 16
BSZ     = 2
M       = BSZ * QLEN        # 32 flattened (batch, query) rows
NQ      = N_HEAD * D_HEAD   # 32
SCALE   = 1.0 / (D_HEAD ** 0.5)
LN_EPS  = 1e-5
NEG_INF = -1e30             # finite "minus infinity"; underflows to exactly 0 after exp in f32


def _layer_norm(x, g, b):
    # PyTorch LayerNorm: biased variance, eps inside sqrt
    mu = jnp.mean(x, axis=-1, keepdims=True)
    var = jnp.mean(jnp.square(x - mu), axis=-1, keepdims=True)
    return (x - mu) * jax.lax.rsqrt(var + LN_EPS) * g + b


def _rel_shift(x):
    """Exact Transformer-XL _rel_shift of a (B*Q, R) block-stacked matrix, Q == R.

    y[p, j] = x[p, j + Q - 1 - p]   for j <= p
            = 0                     for j == p + 1
            = x[p + 1, j - p - 2]   for j >  p + 1      (p = block-local query index)
    Implemented via log2(Q) conditional static lane rotations, one sublane rotation and
    selects -- all VMEM-local, no odd-sized reshapes.
    """
    q = x.shape[-1]
    rows = jax.lax.broadcasted_iota(jnp.int32, x.shape, 0) % q
    cols = jax.lax.broadcasted_iota(jnp.int32, x.shape, 1)
    shift = (q - 1) - rows                                   # per-row left-rotation amount
    a = x
    step = 1
    while step < q:                                          # static; unrolled at trace time
        rolled = jnp.concatenate([a[:, step:], a[:, :step]], axis=1)   # left-rotate by step
        a = jnp.where((shift & step) != 0, rolled, a)
        step *= 2
    b = jnp.concatenate([a[1:, :], a[:1, :]], axis=0)        # a shifted up one row
    d = cols - rows
    return jnp.where(d <= 0, a, jnp.where(d == 1, jnp.zeros_like(x), b))


# ---------------- the fused decoder-layer kernel ----------------
def _decoder_layer_kernel(xb_ref, wproj_ref, wmix_ref, vec_ref, out_ref):
    xb    = xb_ref[...]                                      # (48, 64): [x; r | mask-bias]
    wproj = wproj_ref[...]                                   # (32, 128): [Wq^T|Wk^T|Wv^T|Wr^T]
    wmix  = wmix_ref[...]                                    # (64, 128): [o_w^T | ff_w1^T | ff_w2^T]
    vec   = vec_ref[...]                                     # (8, 128) packed small vectors

    xr     = xb[:, :D_MODEL]                                 # (48, 32): rows 0:32 = x, 32:48 = r
    x      = xr[:M, :]                                       # (32, 32)
    bias2d = xb[:M, D_MODEL:]                                # (32, 32) additive mask (0 / NEG_INF)

    # --- one lane-dense projection matmul for q/k/v (x rows) and r_net (r rows) ---
    proj = jnp.dot(xr, wproj, preferred_element_type=jnp.float32) + vec[0:1, :]   # (48, 128)

    head_vec = []
    for h in range(N_HEAD):                                  # static unroll (N_HEAD == 2)
        c = h * D_HEAD
        q_h  = proj[:M, c:c + D_HEAD]                                  # (32, 16)
        k_h  = proj[:M, NQ + c:NQ + c + D_HEAD]                        # (32, 16)
        v_h  = proj[:M, 2 * NQ + c:2 * NQ + c + D_HEAD]                # (32, 16)
        rk_h = proj[M:, 3 * NQ + c:3 * NQ + c + D_HEAD]                # (16, 16)
        rwb_h = vec[1:2, c:c + D_HEAD]                                 # (1, 16) r_w_bias[h]
        rrb_h = vec[1:2, NQ + c:NQ + c + D_HEAD]                       # (1, 16) r_r_bias[h]

        # Fused AC / pre-shift-BD score matmul: q plus two rank-1 bias rows vs [k | rk].
        kr    = jnp.concatenate([k_h, rk_h], axis=0)                   # (48, 16)
        q_aug = jnp.concatenate([q_h, rwb_h, rrb_h], axis=0)           # (34, 16)
        s = jax.lax.dot_general(q_aug, kr, (((1,), (1,)), ((), ())),
                                preferred_element_type=jnp.float32)    # (34, 48)
        ac = s[:M, :M] + s[M:M + 1, :M]                                # q.kT + r_w_bias.kT
        bd = s[:M, M:] + s[M + 1:M + 2, M:]                            # q.rkT + r_r_bias.rkT
        bd = _rel_shift(bd)                                            # exact rel_shift, (32, 16)
        bd = jnp.concatenate([bd] * BSZ, axis=1)                       # (32, 32); cross-batch
                                                                       # copies masked by bias2d
        score = SCALE * (ac + bd) + bias2d                             # add_and_scale + mask

        mx = jnp.max(score, axis=-1, keepdims=True)
        e = jnp.exp(score - mx)
        prob = e * pl.reciprocal(jnp.sum(e, axis=-1, keepdims=True), approx=True)
        # TODO(synk): dropatt / dropout are identity here (eval-mode semantics).
        head_vec.append(jnp.dot(prob, v_h, preferred_element_type=jnp.float32))   # (32, 16)

    attn_cat = jnp.concatenate(head_vec, axis=1)                       # (32, 32) concat-heads
    o_w = wmix[:NQ, :D_MODEL]                                          # (32, 32)
    attn_out = (jnp.dot(attn_cat, o_w, preferred_element_type=jnp.float32)
                + vec[1:2, 2 * NQ:3 * NQ])                             # + o_b

    x1 = _layer_norm(x + attn_out, vec[2:3, :D_MODEL], vec[2:3, D_MODEL:2 * D_MODEL])

    w1 = wmix[:D_MODEL, D_MODEL:D_MODEL + D_INNER]                     # (32, 64)
    w2 = wmix[:D_INNER, D_MODEL + D_INNER:]                            # (64, 32)
    hid = jnp.maximum(jnp.dot(x1, w1, preferred_element_type=jnp.float32)
                      + vec[3:4, :D_INNER], 0.0)                       # Linear + ReLU
    core = jnp.dot(hid, w2, preferred_element_type=jnp.float32) + vec[1:2, 3 * NQ:]
    out_ref[...] = _layer_norm(x1 + core, vec[2:3, 2 * D_MODEL:3 * D_MODEL],
                               vec[2:3, 3 * D_MODEL:])


# ---------------- JAX wrapper (layout / packing glue only) ----------------
def decoder_layer(dec_inp, r, params, dec_attn_mask):
    """dec_inp: (qlen, bsz, d_model); r: (rlen, d_model);
    dec_attn_mask: bool (qlen, klen) or (bsz, qlen, klen), True == masked.
    Returns (qlen, bsz, d_model)."""
    p = params
    x2d = jnp.transpose(dec_inp, (1, 0, 2)).reshape(M, D_MODEL).astype(jnp.float32)
    xr = jnp.concatenate([x2d, r.astype(jnp.float32)], axis=0)          # (48, 32)

    # Additive attention bias over the flattened (B*Q, B*K) score matrix:
    # NEG_INF on user-masked and cross-batch positions, 0 elsewhere.
    if dec_attn_mask.ndim == 2:
        mask_b = jnp.broadcast_to(dec_attn_mask[None], (BSZ, QLEN, QLEN))
    else:
        mask_b = dec_attn_mask
    notmask = 1.0 - mask_b.astype(jnp.float32)                          # (B, Q, K)
    same_b = jnp.eye(BSZ, dtype=jnp.float32)[:, None, :, None]          # (B, 1, B, 1)
    allowed = same_b * notmask[:, :, None, :]                           # (B, Q, B, K)
    bias2d = ((allowed - 1.0) * (-NEG_INF)).reshape(M, M)               # 0 / NEG_INF

    # slab 1: [x; r | mask-bias]  (48, 64)
    xb = jnp.concatenate([xr, jnp.pad(bias2d, ((0, RLEN), (0, 0)))], axis=1)

    # slab 2: packed projection weights (32, 128) = [Wq^T | Wk^T | Wv^T | Wr^T]
    w_proj = jnp.concatenate([p["qkv_w"], p["rnet_w"]], axis=0).T.astype(jnp.float32)

    # slab 3: packed o_net / FF weights (64, 128) = [o_w^T | ff_w1^T | ff_w2^T]
    top = jnp.concatenate([p["o_w"].T, p["ff_w1"].T], axis=1)           # (32, 96)
    top = jnp.concatenate([top, jnp.zeros((D_INNER - D_MODEL, D_MODEL + D_INNER),
                                          jnp.float32)], axis=0)        # (64, 96)
    w_mix = jnp.concatenate([top, p["ff_w2"].T], axis=1).astype(jnp.float32)   # (64, 128)

    # slab 4: every small vector packed lane-dense into one (8, 128) tile
    row0 = jnp.concatenate([p["qkv_b"], p["rnet_b"]])                   # projection biases
    row1 = jnp.concatenate([p["r_w_bias"].reshape(-1), p["r_r_bias"].reshape(-1),
                            p["o_b"], p["ff_b2"]])
    row2 = jnp.concatenate([p["ln1_g"], p["ln1_b"], p["ln2_g"], p["ln2_b"]])
    row3 = jnp.pad(p["ff_b1"], (0, 128 - D_INNER))
    vec = jnp.pad(jnp.stack([row0, row1, row2, row3]).astype(jnp.float32),
                  ((0, 4), (0, 0)))                                     # (8, 128)

    out2d = pl.pallas_call(
        _decoder_layer_kernel,
        out_shape=jax.ShapeDtypeStruct((M, D_MODEL), jnp.float32),
        # single invocation, no grid: every operand is a whole-array VMEM block (<60 KiB total)
    )(xb, w_proj, w_mix, vec)

    return out2d.reshape(BSZ, QLEN, D_MODEL).transpose(1, 0, 2)         # back to (Q, B, D)


# ---------------- pure-JAX reference (literal translation of the PyTorch module) ----------------
def decoder_layer_reference(dec_inp, r, params, dec_attn_mask):
    p = params
    HI = jax.lax.Precision.HIGHEST
    qlen, bsz, _ = dec_inp.shape
    rlen = r.shape[0]
    w_heads = jnp.einsum('qbd,ed->qbe', dec_inp, p["qkv_w"], precision=HI) + p["qkv_b"]
    r_head_k = jnp.einsum('rd,ed->re', r, p["rnet_w"], precision=HI) + p["rnet_b"]
    w_head_q, w_head_k, w_head_v = jnp.split(w_heads, 3, axis=-1)
    w_head_q = w_head_q.reshape(qlen, bsz, N_HEAD, D_HEAD)
    w_head_k = w_head_k.reshape(qlen, bsz, N_HEAD, D_HEAD)
    w_head_v = w_head_v.reshape(qlen, bsz, N_HEAD, D_HEAD)
    r_head_k = r_head_k.reshape(rlen, N_HEAD, D_HEAD)
    AC = jnp.einsum('ibnd,jbnd->bnij', w_head_q + p["r_w_bias"], w_head_k, precision=HI)
    BD = jnp.einsum('ibnd,jnd->bnij', w_head_q + p["r_r_bias"], r_head_k, precision=HI)
    B, N, Q, R = BD.shape
    zero_pad = jnp.zeros((B, N, Q, 1), BD.dtype)
    x_padded = jnp.concatenate([zero_pad, BD], axis=3).reshape(B, N, R + 1, Q)
    BD = x_padded[:, :, 1:, :].reshape(B, N, Q, R)
    attn_score = SCALE * (AC + BD)
    msk = dec_attn_mask[None, None] if dec_attn_mask.ndim == 2 else dec_attn_mask[:, None]
    attn_score = jnp.where(msk, -jnp.inf, attn_score)
    attn_prob = jax.nn.softmax(attn_score, axis=3)
    attn_vec = jnp.einsum('bnij,jbnd->ibnd', attn_prob, w_head_v, precision=HI)
    attn_vec = attn_vec.reshape(qlen, bsz, N_HEAD * D_HEAD)
    attn_out = jnp.einsum('ibe,oe->ibo', attn_vec, p["o_w"], precision=HI) + p["o_b"]
    out1 = _layer_norm(dec_inp + attn_out, p["ln1_g"], p["ln1_b"])
    h = jax.nn.relu(jnp.einsum('ibd,hd->ibh', out1, p["ff_w1"], precision=HI) + p["ff_b1"])
    core = jnp.einsum('ibh,dh->ibd', h, p["ff_w2"], precision=HI) + p["ff_b2"]
    return _layer_norm(out1 + core, p["ln2_g"], p["ln2_b"])


# ---------------- deterministic setup + run ----------------
if __name__ == "__main__":
    key = jax.random.PRNGKey(0)
    ks = jax.random.split(key, 16)
    init = lambda k, s: (0.15 * jax.random.normal(k, s)).astype(jnp.float32)

    params = dict(
        qkv_w=init(ks[0], (3 * N_HEAD * D_HEAD, D_MODEL)),
        qkv_b=init(ks[1], (3 * N_HEAD * D_HEAD,)),
        rnet_w=init(ks[2], (N_HEAD * D_HEAD, D_MODEL)),
        rnet_b=init(ks[3], (N_HEAD * D_HEAD,)),
        r_w_bias=init(ks[4], (N_HEAD, D_HEAD)),
        r_r_bias=init(ks[5], (N_HEAD, D_HEAD)),
        o_w=init(ks[6], (D_MODEL, N_HEAD * D_HEAD)),
        o_b=init(ks[7], (D_MODEL,)),
        ln1_g=jnp.ones((D_MODEL,), jnp.float32),
        ln1_b=jnp.zeros((D_MODEL,), jnp.float32),
        ff_w1=init(ks[8], (D_INNER, D_MODEL)),
        ff_b1=init(ks[9], (D_INNER,)),
        ff_w2=init(ks[10], (D_MODEL, D_INNER)),
        ff_b2=init(ks[11], (D_MODEL,)),
        ln2_g=jnp.ones((D_MODEL,), jnp.float32),
        ln2_b=jnp.zeros((D_MODEL,), jnp.float32),
    )

    dec_inp = jax.random.normal(ks[12], (QLEN, BSZ, D_MODEL), jnp.float32)
    r = jax.random.normal(ks[13], (RLEN, D_MODEL), jnp.float32)
    idx = jnp.arange(QLEN)
    dec_attn_mask = idx[None, :] > idx[:, None]                          # causal, True = masked

    out = jax.jit(decoder_layer)(dec_inp, r, params, dec_attn_mask)
    out = jax.block_until_ready(out)
    assert out.shape == (QLEN, BSZ, D_MODEL)
    assert bool(jnp.all(jnp.isfinite(out)))

    ref = decoder_layer_reference(dec_inp, r, params, dec_attn_mask)
    err = float(jnp.max(jnp.abs(out - ref)))
    # loose tolerance: covers approx-reciprocal / matmul-precision noise, still catches logic bugs
    assert err < 5e-2, f"kernel deviates from reference: max|diff|={err}"
    print("KERNEL_OK")
</pallas_src>

<mosaic_0001>
module attributes {stable_mosaic.version = 11 : i64} {
  func.func @_decoder_layer_kernel(%arg0: memref<48x64xf32, #tpu.memory_space<vmem>>, %arg1: memref<32x128xf32, #tpu.memory_space<vmem>>, %arg2: memref<64x128xf32, #tpu.memory_space<vmem>>, %arg3: memref<8x128xf32, #tpu.memory_space<vmem>>, %arg4: memref<32x32xf32, #tpu.memory_space<vmem>>) attributes {dimension_semantics = [], scalar_prefetch = 0 : i64, scratch_operands = 0 : i64, tpu.core_type = #tpu.core_type<tc>} {
    %c0 = arith.constant 0 : index
    %c0_0 = arith.constant 0 : index
    %0 = vector.load %arg0[%c0, %c0_0] : memref<48x64xf32, #tpu.memory_space<vmem>>, vector<48x64xf32>
    %c0_1 = arith.constant 0 : index
    %c0_2 = arith.constant 0 : index
    %1 = vector.load %arg1[%c0_1, %c0_2] : memref<32x128xf32, #tpu.memory_space<vmem>>, vector<32x128xf32>
    %c0_3 = arith.constant 0 : index
    %c0_4 = arith.constant 0 : index
    %2 = vector.load %arg2[%c0_3, %c0_4] : memref<64x128xf32, #tpu.memory_space<vmem>>, vector<64x128xf32>
    %c0_5 = arith.constant 0 : index
    %c0_6 = arith.constant 0 : index
    %3 = vector.load %arg3[%c0_5, %c0_6] : memref<8x128xf32, #tpu.memory_space<vmem>>, vector<8x128xf32>
    %4 = vector.extract_strided_slice %0 {offsets = [0, 0], sizes = [48, 32], strides = [1, 1]} : vector<48x64xf32> to vector<48x32xf32>
    %5 = vector.extract_strided_slice %4 {offsets = [0, 0], sizes = [32, 32], strides = [1, 1]} : vector<48x32xf32> to vector<32x32xf32>
    %6 = vector.extract_strided_slice %0 {offsets = [0, 32], sizes = [32, 32], strides = [1, 1]} : vector<48x64xf32> to vector<32x32xf32>
    %cst = arith.constant dense<0.000000e+00> : vector<48x128xf32>
    %7 = tpu.matmul %4, %1, %cst {dimension_numbers = #tpu.dot_dimension_numbers<[1], [0], [0], [1], [0, 0, 1, 1], [], []>} : vector<48x32xf32>, vector<32x128xf32>, vector<48x128xf32> -> vector<48x128xf32>
    %8 = vector.extract_strided_slice %3 {offsets = [0, 0], sizes = [1, 128], strides = [1, 1]} : vector<8x128xf32> to vector<1x128xf32>
    %9 = vector.broadcast %8 : vector<1x128xf32> to vector<48x128xf32>
    %10 = arith.addf %7, %9 : vector<48x128xf32>
    %11 = vector.extract_strided_slice %10 {offsets = [0, 0], sizes = [32, 16], strides = [1, 1]} : vector<48x128xf32> to vector<32x16xf32>
    %12 = vector.extract_strided_slice %10 {offsets = [0, 32], sizes = [32, 16], strides = [1, 1]} : vector<48x128xf32> to vector<32x16xf32>
    %13 = vector.extract_strided_slice %10 {offsets = [0, 64], sizes = [32, 16], strides = [1, 1]} : vector<48x128xf32> to vector<32x16xf32>
    %14 = vector.extract_strided_slice %10 {offsets = [32, 96], sizes = [16, 16], strides = [1, 1]} : vector<48x128xf32> to vector<16x16xf32>
    %15 = vector.extract_strided_slice %3 {offsets = [1, 0], sizes = [1, 16], strides = [1, 1]} : vector<8x128xf32> to vector<1x16xf32>
    %16 = vector.extract_strided_slice %3 {offsets = [1, 32], sizes = [1, 16], strides = [1, 1]} : vector<8x128xf32> to vector<1x16xf32>
    %17 = tpu.concatenate %12, %14 in 0 : vector<32x16xf32>, vector<16x16xf32> -> vector<48x16xf32>
    %18 = tpu.concatenate %11, %15, %16 in 0 : vector<32x16xf32>, vector<1x16xf32>, vector<1x16xf32> -> vector<34x16xf32>
    %cst_7 = arith.constant dense<0.000000e+00> : vector<34x48xf32>
    %19 = tpu.matmul %18, %17, %cst_7 {dimension_numbers = #tpu.dot_dimension_numbers<[1], [1], [0], [0], [0, 0, 1, 0], [], []>} : vector<34x16xf32>, vector<48x16xf32>, vector<34x48xf32> -> vector<34x48xf32>
    %20 = vector.extract_strided_slice %19 {offsets = [0, 0], sizes = [32, 32], strides = [1, 1]} : vector<34x48xf32> to vector<32x32xf32>
    %21 = vector.extract_strided_slice %19 {offsets = [32, 0], sizes = [1, 32], strides = [1, 1]} : vector<34x48xf32> to vector<1x32xf32>
    %22 = vector.broadcast %21 : vector<1x32xf32> to vector<32x32xf32>
    %23 = arith.addf %20, %22 : vector<32x32xf32>
    %24 = vector.extract_strided_slice %19 {offsets = [0, 32], sizes = [32, 16], strides = [1, 1]} : vector<34x48xf32> to vector<32x16xf32>
    %25 = vector.extract_strided_slice %19 {offsets = [33, 32], sizes = [1, 16], strides = [1, 1]} : vector<34x48xf32> to vector<1x16xf32>
    %26 = vector.broadcast %25 : vector<1x16xf32> to vector<32x16xf32>
    %27 = arith.addf %24, %26 : vector<32x16xf32>
    %28 = tpu.iota {dimensions = array<i32: 0>} : vector<32x16xi32>
    %c16_i32 = arith.constant 16 : i32
    %c0_i32 = arith.constant 0 : i32
    %29 = arith.cmpi eq, %c16_i32, %c0_i32 : i32
    %c1_i32 = arith.constant 1 : i32
    %30 = arith.select %29, %c1_i32, %c16_i32 : i32
    %31 = vector.broadcast %30 : i32 to vector<32x16xi32>
    %32 = arith.remsi %28, %31 : vector<32x16xi32>
    %c0_i32_8 = arith.constant 0 : i32
    %33 = vector.broadcast %c0_i32_8 : i32 to vector<32x16xi32>
    %34 = arith.cmpi ne, %32, %33 : vector<32x16xi32>
    %c0_i32_9 = arith.constant 0 : i32
    %35 = vector.broadcast %c0_i32_9 : i32 to vector<32x16xi32>
    %36 = arith.cmpi slt, %32, %35 : vector<32x16xi32>
    %c0_i32_10 = arith.constant 0 : i32
    %37 = arith.cmpi slt, %30, %c0_i32_10 : i32
    %38 = vector.broadcast %37 : i1 to vector<32x16xi1>
    %39 = vector.broadcast %38 : vector<32x16xi1> to vector<32x16xi1>
    %40 = arith.xori %36, %39 : vector<32x16xi1>
    %41 = arith.andi %40, %34 : vector<32x16xi1>
    %42 = vector.broadcast %30 : i32 to vector<32x16xi32>
    %43 = arith.addi %32, %42 : vector<32x16xi32>
    %44 = arith.select %41, %43, %32 : vector<32x16xi1>, vector<32x16xi32>
    %45 = tpu.iota {dimensions = array<i32: 1>} : vector<32x16xi32>
    %c15_i32 = arith.constant 15 : i32
    %46 = vector.broadcast %c15_i32 : i32 to vector<32x16xi32>
    %47 = arith.subi %46, %44 : vector<32x16xi32>
    %48 = vector.extract_strided_slice %27 {offsets = [0, 1], sizes = [32, 15], strides = [1, 1]} : vector<32x16xf32> to vector<32x15xf32>
    %49 = vector.extract_strided_slice %27 {offsets = [0, 0], sizes = [32, 1], strides = [1, 1]} : vector<32x16xf32> to vector<32x1xf32>
    %50 = tpu.concatenate %48, %49 in 1 : vector<32x15xf32>, vector<32x1xf32> -> vector<32x16xf32>
    %c1_i32_11 = arith.constant 1 : i32
    %51 = vector.broadcast %c1_i32_11 : i32 to vector<32x16xi32>
    %52 = arith.andi %47, %51 : vector<32x16xi32>
    %c0_i32_12 = arith.constant 0 : i32
    %53 = vector.broadcast %c0_i32_12 : i32 to vector<32x16xi32>
    %54 = arith.cmpi ne, %52, %53 : vector<32x16xi32>
    %55 = arith.select %54, %50, %27 : vector<32x16xi1>, vector<32x16xf32>
    %56 = vector.extract_strided_slice %55 {offsets = [0, 2], sizes = [32, 14], strides = [1, 1]} : vector<32x16xf32> to vector<32x14xf32>
    %57 = vector.extract_strided_slice %55 {offsets = [0, 0], sizes = [32, 2], strides = [1, 1]} : vector<32x16xf32> to vector<32x2xf32>
    %58 = tpu.concatenate %56, %57 in 1 : vector<32x14xf32>, vector<32x2xf32> -> vector<32x16xf32>
    %c2_i32 = arith.constant 2 : i32
    %59 = vector.broadcast %c2_i32 : i32 to vector<32x16xi32>
    %60 = arith.andi %47, %59 : vector<32x16xi32>
    %c0_i32_13 = arith.constant 0 : i32
    %61 = vector.broadcast %c0_i32_13 : i32 to vector<32x16xi32>
    %62 = arith.cmpi ne, %60, %61 : vector<32x16xi32>
    %63 = arith.select %62, %58, %55 : vector<32x16xi1>, vector<32x16xf32>
    %64 = vector.extract_strided_slice %63 {offsets = [0, 4], sizes = [32, 12], strides = [1, 1]} : vector<32x16xf32> to vector<32x12xf32>
    %65 = vector.extract_strided_slice %63 {offsets = [0, 0], sizes = [32, 4], strides = [1, 1]} : vector<32x16xf32> to vector<32x4xf32>
    %66 = tpu.concatenate %64, %65 in 1 : vector<32x12xf32>, vector<32x4xf32> -> vector<32x16xf32>
    %c4_i32 = arith.constant 4 : i32
    %67 = vector.broadcast %c4_i32 : i32 to vector<32x16xi32>
    %68 = arith.andi %47, %67 : vector<32x16xi32>
    %c0_i32_14 = arith.constant 0 : i32
    %69 = vector.broadcast %c0_i32_14 : i32 to vector<32x16xi32>
    %70 = arith.cmpi ne, %68, %69 : vector<32x16xi32>
    %71 = arith.select %70, %66, %63 : vector<32x16xi1>, vector<32x16xf32>
    %72 = vector.extract_strided_slice %71 {offsets = [0, 8], sizes = [32, 8], strides = [1, 1]} : vector<32x16xf32> to vector<32x8xf32>
    %73 = vector.extract_strided_slice %71 {offsets = [0, 0], sizes = [32, 8], strides = [1, 1]} : vector<32x16xf32> to vector<32x8xf32>
    %74 = tpu.concatenate %72, %73 in 1 : vector<32x8xf32>, vector<32x8xf32> -> vector<32x16xf32>
    %c8_i32 = arith.constant 8 : i32
    %75 = vector.broadcast %c8_i32 : i32 to vector<32x16xi32>
    %76 = arith.andi %47, %75 : vector<32x16xi32>
    %c0_i32_15 = arith.constant 0 : i32
    %77 = vector.broadcast %c0_i32_15 : i32 to vector<32x16xi32>
    %78 = arith.cmpi ne, %76, %77 : vector<32x16xi32>
    %79 = arith.select %78, %74, %71 : vector<32x16xi1>, vector<32x16xf32>
    %80 = vector.extract_strided_slice %79 {offsets = [1, 0], sizes = [31, 16], strides = [1, 1]} : vector<32x16xf32> to vector<31x16xf32>
    %81 = vector.extract_strided_slice %79 {offsets = [0, 0], sizes = [1, 16], strides = [1, 1]} : vector<32x16xf32> to vector<1x16xf32>
    %82 = tpu.concatenate %80, %81 in 0 : vector<31x16xf32>, vector<1x16xf32> -> vector<32x16xf32>
    %83 = arith.subi %45, %44 : vector<32x16xi32>
    %c0_i32_16 = arith.constant 0 : i32
    %84 = vector.broadcast %c0_i32_16 : i32 to vector<32x16xi32>
    %85 = arith.cmpi sle, %83, %84 : vector<32x16xi32>
    %c1_i32_17 = arith.constant 1 : i32
    %86 = vector.broadcast %c1_i32_17 : i32 to vector<32x16xi32>
    %87 = arith.cmpi eq, %83, %86 : vector<32x16xi32>
    %cst_18 = arith.constant 0.000000e+00 : f32
    %88 = vector.broadcast %cst_18 : f32 to vector<32x16xf32>
    %89 = arith.select %87, %88, %82 : vector<32x16xi1>, vector<32x16xf32>
    %90 = arith.select %85, %79, %89 : vector<32x16xi1>, vector<32x16xf32>
    %91 = tpu.concatenate %90, %90 in 1 : vector<32x16xf32>, vector<32x16xf32> -> vector<32x32xf32>
    %92 = arith.addf %23, %91 : vector<32x32xf32>
    %cst_19 = arith.constant 2.500000e-01 : f32
    %93 = vector.broadcast %cst_19 : f32 to vector<32x32xf32>
    %94 = arith.mulf %93, %92 : vector<32x32xf32>
    %95 = arith.addf %94, %6 : vector<32x32xf32>
    %cst_20 = arith.constant dense<0xFF800000> : vector<32xf32>
    %96 = vector.multi_reduction <maximumf>, %95, %cst_20 [1] : vector<32x32xf32> to vector<32xf32>
    %97 = vector.shape_cast %96 : vector<32xf32> to vector<32x1xf32>
    %98 = vector.broadcast %97 : vector<32x1xf32> to vector<32x32xf32>
    %99 = arith.subf %95, %98 : vector<32x32xf32>
    %100 = math.exp %99 : vector<32x32xf32>
    %cst_21 = arith.constant dense<0.000000e+00> : vector<32xf32>
    %101 = vector.multi_reduction <add>, %100, %cst_21 [1] : vector<32x32xf32> to vector<32xf32>
    %102 = vector.shape_cast %101 : vector<32xf32> to vector<32x1xf32>
    %103 = tpu.reciprocal %102 {approx = true} : vector<32x1xf32> -> vector<32x1xf32>
    %104 = vector.broadcast %103 : vector<32x1xf32> to vector<32x32xf32>
    %105 = arith.mulf %100, %104 : vector<32x32xf32>
    %cst_22 = arith.constant dense<0.000000e+00> : vector<32x16xf32>
    %106 = tpu.matmul %105, %13, %cst_22 {dimension_numbers = #tpu.dot_dimension_numbers<[1], [0], [0], [1], [0, 0, 1, 1], [], []>} : vector<32x32xf32>, vector<32x16xf32>, vector<32x16xf32> -> vector<32x16xf32>
    %107 = vector.extract_strided_slice %10 {offsets = [0, 16], sizes = [32, 16], strides = [1, 1]} : vector<48x128xf32> to vector<32x16xf32>
    %108 = vector.extract_strided_slice %10 {offsets = [0, 48], sizes = [32, 16], strides = [1, 1]} : vector<48x128xf32> to vector<32x16xf32>
    %109 = vector.extract_strided_slice %10 {offsets = [0, 80], sizes = [32, 16], strides = [1, 1]} : vector<48x128xf32> to vector<32x16xf32>
    %110 = vector.extract_strided_slice %10 {offsets = [32, 112], sizes = [16, 16], strides = [1, 1]} : vector<48x128xf32> to vector<16x16xf32>
    %111 = vector.extract_strided_slice %3 {offsets = [1, 16], sizes = [1, 16], strides = [1, 1]} : vector<8x128xf32> to vector<1x16xf32>
    %112 = vector.extract_strided_slice %3 {offsets = [1, 48], sizes = [1, 16], strides = [1, 1]} : vector<8x128xf32> to vector<1x16xf32>
    %113 = tpu.concatenate %108, %110 in 0 : vector<32x16xf32>, vector<16x16xf32> -> vector<48x16xf32>
    %114 = tpu.concatenate %107, %111, %112 in 0 : vector<32x16xf32>, vector<1x16xf32>, vector<1x16xf32> -> vector<34x16xf32>
    %cst_23 = arith.constant dense<0.000000e+00> : vector<34x48xf32>
    %115 = tpu.matmul %114, %113, %cst_23 {dimension_numbers = #tpu.dot_dimension_numbers<[1], [1], [0], [0], [0, 0, 1, 0], [], []>} : vector<34x16xf32>, vector<48x16xf32>, vector<34x48xf32> -> vector<34x48xf32>
    %116 = vector.extract_strided_slice %115 {offsets = [0, 0], sizes = [32, 32], strides = [1, 1]} : vector<34x48xf32> to vector<32x32xf32>
    %117 = vector.extract_strided_slice %115 {offsets = [32, 0], sizes = [1, 32], strides = [1, 1]} : vector<34x48xf32> to vector<1x32xf32>
    %118 = vector.broadcast %117 : vector<1x32xf32> to vector<32x32xf32>
    %119 = arith.addf %116, %118 : vector<32x32xf32>
    %120 = vector.extract_strided_slice %115 {offsets = [0, 32], sizes = [32, 16], strides = [1, 1]} : vector<34x48xf32> to vector<32x16xf32>
    %121 = vector.extract_strided_slice %115 {offsets = [33, 32], sizes = [1, 16], strides = [1, 1]} : vector<34x48xf32> to vector<1x16xf32>
    %122 = vector.broadcast %121 : vector<1x16xf32> to vector<32x16xf32>
    %123 = arith.addf %120, %122 : vector<32x16xf32>
    %124 = tpu.iota {dimensions = array<i32: 0>} : vector<32x16xi32>
    %c16_i32_24 = arith.constant 16 : i32
    %c0_i32_25 = arith.constant 0 : i32
    %125 = arith.cmpi eq, %c16_i32_24, %c0_i32_25 : i32
    %c1_i32_26 = arith.constant 1 : i32
    %126 = arith.select %125, %c1_i32_26, %c16_i32_24 : i32
    %127 = vector.broadcast %126 : i32 to vector<32x16xi32>
    %128 = arith.remsi %124, %127 : vector<32x16xi32>
    %c0_i32_27 = arith.constant 0 : i32
    %129 = vector.broadcast %c0_i32_27 : i32 to vector<32x16xi32>
    %130 = arith.cmpi ne, %128, %129 : vector<32x16xi32>
    %c0_i32_28 = arith.constant 0 : i32
    %131 = vector.broadcast %c0_i32_28 : i32 to vector<32x16xi32>
    %132 = arith.cmpi slt, %128, %131 : vector<32x16xi32>
    %c0_i32_29 = arith.constant 0 : i32
    %133 = arith.cmpi slt, %126, %c0_i32_29 : i32
    %134 = vector.broadcast %133 : i1 to vector<32x16xi1>
    %135 = vector.broadcast %134 : vector<32x16xi1> to vector<32x16xi1>
    %136 = arith.xori %132, %135 : vector<32x16xi1>
    %137 = arith.andi %136, %130 : vector<32x16xi1>
    %138 = vector.broadcast %126 : i32 to vector<32x16xi32>
    %139 = arith.addi %128, %138 : vector<32x16xi32>
    %140 = arith.select %137, %139, %128 : vector<32x16xi1>, vector<32x16xi32>
    %141 = tpu.iota {dimensions = array<i32: 1>} : vector<32x16xi32>
    %c15_i32_30 = arith.constant 15 : i32
    %142 = vector.broadcast %c15_i32_30 : i32 to vector<32x16xi32>
    %143 = arith.subi %142, %140 : vector<32x16xi32>
    %144 = vector.extract_strided_slice %123 {offsets = [0, 1], sizes = [32, 15], strides = [1, 1]} : vector<32x16xf32> to vector<32x15xf32>
    %145 = vector.extract_strided_slice %123 {offsets = [0, 0], sizes = [32, 1], strides = [1, 1]} : vector<32x16xf32> to vector<32x1xf32>
    %146 = tpu.concatenate %144, %145 in 1 : vector<32x15xf32>, vector<32x1xf32> -> vector<32x16xf32>
    %c1_i32_31 = arith.constant 1 : i32
    %147 = vector.broadcast %c1_i32_31 : i32 to vector<32x16xi32>
    %148 = arith.andi %143, %147 : vector<32x16xi32>
    %c0_i32_32 = arith.constant 0 : i32
    %149 = vector.broadcast %c0_i32_32 : i32 to vector<32x16xi32>
    %150 = arith.cmpi ne, %148, %149 : vector<32x16xi32>
    %151 = arith.select %150, %146, %123 : vector<32x16xi1>, vector<32x16xf32>
    %152 = vector.extract_strided_slice %151 {offsets = [0, 2], sizes = [32, 14], strides = [1, 1]} : vector<32x16xf32> to vector<32x14xf32>
    %153 = vector.extract_strided_slice %151 {offsets = [0, 0], sizes = [32, 2], strides = [1, 1]} : vector<32x16xf32> to vector<32x2xf32>
    %154 = tpu.concatenate %152, %153 in 1 : vector<32x14xf32>, vector<32x2xf32> -> vector<32x16xf32>
    %c2_i32_33 = arith.constant 2 : i32
    %155 = vector.broadcast %c2_i32_33 : i32 to vector<32x16xi32>
    %156 = arith.andi %143, %155 : vector<32x16xi32>
    %c0_i32_34 = arith.constant 0 : i32
    %157 = vector.broadcast %c0_i32_34 : i32 to vector<32x16xi32>
    %158 = arith.cmpi ne, %156, %157 : vector<32x16xi32>
    %159 = arith.select %158, %154, %151 : vector<32x16xi1>, vector<32x16xf32>
    %160 = vector.extract_strided_slice %159 {offsets = [0, 4], sizes = [32, 12], strides = [1, 1]} : vector<32x16xf32> to vector<32x12xf32>
    %161 = vector.extract_strided_slice %159 {offsets = [0, 0], sizes = [32, 4], strides = [1, 1]} : vector<32x16xf32> to vector<32x4xf32>
    %162 = tpu.concatenate %160, %161 in 1 : vector<32x12xf32>, vector<32x4xf32> -> vector<32x16xf32>
    %c4_i32_35 = arith.constant 4 : i32
    %163 = vector.broadcast %c4_i32_35 : i32 to vector<32x16xi32>
    %164 = arith.andi %143, %163 : vector<32x16xi32>
    %c0_i32_36 = arith.constant 0 : i32
    %165 = vector.broadcast %c0_i32_36 : i32 to vector<32x16xi32>
    %166 = arith.cmpi ne, %164, %165 : vector<32x16xi32>
    %167 = arith.select %166, %162, %159 : vector<32x16xi1>, vector<32x16xf32>
    %168 = vector.extract_strided_slice %167 {offsets = [0, 8], sizes = [32, 8], strides = [1, 1]} : vector<32x16xf32> to vector<32x8xf32>
    %169 = vector.extract_strided_slice %167 {offsets = [0, 0], sizes = [32, 8], strides = [1, 1]} : vector<32x16xf32> to vector<32x8xf32>
    %170 = tpu.concatenate %168, %169 in 1 : vector<32x8xf32>, vector<32x8xf32> -> vector<32x16xf32>
    %c8_i32_37 = arith.constant 8 : i32
    %171 = vector.broadcast %c8_i32_37 : i32 to vector<32x16xi32>
    %172 = arith.andi %143, %171 : vector<32x16xi32>
    %c0_i32_38 = arith.constant 0 : i32
    %173 = vector.broadcast %c0_i32_38 : i32 to vector<32x16xi32>
    %174 = arith.cmpi ne, %172, %173 : vector<32x16xi32>
    %175 = arith.select %174, %170, %167 : vector<32x16xi1>, vector<32x16xf32>
    %176 = vector.extract_strided_slice %175 {offsets = [1, 0], sizes = [31, 16], strides = [1, 1]} : vector<32x16xf32> to vector<31x16xf32>
    %177 = vector.extract_strided_slice %175 {offsets = [0, 0], sizes = [1, 16], strides = [1, 1]} : vector<32x16xf32> to vector<1x16xf32>
    %178 = tpu.concatenate %176, %177 in 0 : vector<31x16xf32>, vector<1x16xf32> -> vector<32x16xf32>
    %179 = arith.subi %141, %140 : vector<32x16xi32>
    %c0_i32_39 = arith.constant 0 : i32
    %180 = vector.broadcast %c0_i32_39 : i32 to vector<32x16xi32>
    %181 = arith.cmpi sle, %179, %180 : vector<32x16xi32>
    %c1_i32_40 = arith.constant 1 : i32
    %182 = vector.broadcast %c1_i32_40 : i32 to vector<32x16xi32>
    %183 = arith.cmpi eq, %179, %182 : vector<32x16xi32>
    %cst_41 = arith.constant 0.000000e+00 : f32
    %184 = vector.broadcast %cst_41 : f32 to vector<32x16xf32>
    %185 = arith.select %183, %184, %178 : vector<32x16xi1>, vector<32x16xf32>
    %186 = arith.select %181, %175, %185 : vector<32x16xi1>, vector<32x16xf32>
    %187 = tpu.concatenate %186, %186 in 1 : vector<32x16xf32>, vector<32x16xf32> -> vector<32x32xf32>
    %188 = arith.addf %119, %187 : vector<32x32xf32>
    %cst_42 = arith.constant 2.500000e-01 : f32
    %189 = vector.broadcast %cst_42 : f32 to vector<32x32xf32>
    %190 = arith.mulf %189, %188 : vector<32x32xf32>
    %191 = arith.addf %190, %6 : vector<32x32xf32>
    %cst_43 = arith.constant dense<0xFF800000> : vector<32xf32>
    %192 = vector.multi_reduction <maximumf>, %191, %cst_43 [1] : vector<32x32xf32> to vector<32xf32>
    %193 = vector.shape_cast %192 : vector<32xf32> to vector<32x1xf32>
    %194 = vector.broadcast %193 : vector<32x1xf32> to vector<32x32xf32>
    %195 = arith.subf %191, %194 : vector<32x32xf32>
    %196 = math.exp %195 : vector<32x32xf32>
    %cst_44 = arith.constant dense<0.000000e+00> : vector<32xf32>
    %197 = vector.multi_reduction <add>, %196, %cst_44 [1] : vector<32x32xf32> to vector<32xf32>
    %198 = vector.shape_cast %197 : vector<32xf32> to vector<32x1xf32>
    %199 = tpu.reciprocal %198 {approx = true} : vector<32x1xf32> -> vector<32x1xf32>
    %200 = vector.broadcast %199 : vector<32x1xf32> to vector<32x32xf32>
    %201 = arith.mulf %196, %200 : vector<32x32xf32>
    %cst_45 = arith.constant dense<0.000000e+00> : vector<32x16xf32>
    %202 = tpu.matmul %201, %109, %cst_45 {dimension_numbers = #tpu.dot_dimension_numbers<[1], [0], [0], [1], [0, 0, 1, 1], [], []>} : vector<32x32xf32>, vector<32x16xf32>, vector<32x16xf32> -> vector<32x16xf32>
    %203 = tpu.concatenate %106, %202 in 1 : vector<32x16xf32>, vector<32x16xf32> -> vector<32x32xf32>
    %204 = vector.extract_strided_slice %2 {offsets = [0, 0], sizes = [32, 32], strides = [1, 1]} : vector<64x128xf32> to vector<32x32xf32>
    %cst_46 = arith.constant dense<0.000000e+00> : vector<32x32xf32>
    %205 = tpu.matmul %203, %204, %cst_46 {dimension_numbers = #tpu.dot_dimension_numbers<[1], [0], [0], [1], [0, 0, 1, 1], [], []>} : vector<32x32xf32>, vector<32x32xf32>, vector<32x32xf32> -> vector<32x32xf32>
    %206 = vector.extract_strided_slice %3 {offsets = [1, 64], sizes = [1, 32], strides = [1, 1]} : vector<8x128xf32> to vector<1x32xf32>
    %207 = vector.broadcast %206 : vector<1x32xf32> to vector<32x32xf32>
    %208 = arith.addf %205, %207 : vector<32x32xf32>
    %209 = arith.addf %5, %208 : vector<32x32xf32>
    %210 = vector.extract_strided_slice %3 {offsets = [2, 0], sizes = [1, 32], strides = [1, 1]} : vector<8x128xf32> to vector<1x32xf32>
    %211 = vector.extract_strided_slice %3 {offsets = [2, 32], sizes = [1, 32], strides = [1, 1]} : vector<8x128xf32> to vector<1x32xf32>
    %cst_47 = arith.constant dense<0.000000e+00> : vector<32xf32>
    %212 = vector.multi_reduction <add>, %209, %cst_47 [1] : vector<32x32xf32> to vector<32xf32>
    %213 = vector.shape_cast %212 : vector<32xf32> to vector<32x1xf32>
    %cst_48 = arith.constant 3.200000e+01 : f32
    %214 = vector.broadcast %cst_48 : f32 to vector<32x1xf32>
    %215 = arith.divf %213, %214 : vector<32x1xf32>
    %216 = vector.broadcast %215 : vector<32x1xf32> to vector<32x32xf32>
    %217 = arith.subf %209, %216 : vector<32x32xf32>
    %218 = arith.mulf %217, %217 : vector<32x32xf32>
    %cst_49 = arith.constant dense<0.000000e+00> : vector<32xf32>
    %219 = vector.multi_reduction <add>, %218, %cst_49 [1] : vector<32x32xf32> to vector<32xf32>
    %220 = vector.shape_cast %219 : vector<32xf32> to vector<32x1xf32>
    %cst_50 = arith.constant 3.200000e+01 : f32
    %221 = vector.broadcast %cst_50 : f32 to vector<32x1xf32>
    %222 = arith.divf %220, %221 : vector<32x1xf32>
    %223 = vector.broadcast %215 : vector<32x1xf32> to vector<32x32xf32>
    %224 = arith.subf %209, %223 : vector<32x32xf32>
    %cst_51 = arith.constant 9.99999974E-6 : f32
    %225 = vector.broadcast %cst_51 : f32 to vector<32x1xf32>
    %226 = arith.addf %222, %225 : vector<32x1xf32>
    %227 = math.rsqrt %226 : vector<32x1xf32>
    %228 = vector.broadcast %227 : vector<32x1xf32> to vector<32x32xf32>
    %229 = arith.mulf %224, %228 : vector<32x32xf32>
    %230 = vector.broadcast %210 : vector<1x32xf32> to vector<32x32xf32>
    %231 = arith.mulf %229, %230 : vector<32x32xf32>
    %232 = vector.broadcast %211 : vector<1x32xf32> to vector<32x32xf32>
    %233 = arith.addf %231, %232 : vector<32x32xf32>
    %234 = vector.extract_strided_slice %2 {offsets = [0, 32], sizes = [32, 64], strides = [1, 1]} : vector<64x128xf32> to vector<32x64xf32>
    %235 = vector.extract_strided_slice %2 {offsets = [0, 96], sizes = [64, 32], strides = [1, 1]} : vector<64x128xf32> to vector<64x32xf32>
    %cst_52 = arith.constant dense<0.000000e+00> : vector<32x64xf32>
    %236 = tpu.matmul %233, %234, %cst_52 {dimension_numbers = #tpu.dot_dimension_numbers<[1], [0], [0], [1], [0, 0, 1, 1], [], []>} : vector<32x32xf32>, vector<32x64xf32>, vector<32x64xf32> -> vector<32x64xf32>
    %237 = vector.extract_strided_slice %3 {offsets = [3, 0], sizes = [1, 64], strides = [1, 1]} : vector<8x128xf32> to vector<1x64xf32>
    %238 = vector.broadcast %237 : vector<1x64xf32> to vector<32x64xf32>
    %239 = arith.addf %236, %238 : vector<32x64xf32>
    %cst_53 = arith.constant 0.000000e+00 : f32
    %240 = vector.broadcast %cst_53 : f32 to vector<32x64xf32>
    %241 = arith.maximumf %239, %240 : vector<32x64xf32>
    %cst_54 = arith.constant dense<0.000000e+00> : vector<32x32xf32>
    %242 = tpu.matmul %241, %235, %cst_54 {dimension_numbers = #tpu.dot_dimension_numbers<[1], [0], [0], [1], [0, 0, 1, 1], [], []>} : vector<32x64xf32>, vector<64x32xf32>, vector<32x32xf32> -> vector<32x32xf32>
    %243 = vector.extract_strided_slice %3 {offsets = [1, 96], sizes = [1, 32], strides = [1, 1]} : vector<8x128xf32> to vector<1x32xf32>
    %244 = vector.broadcast %243 : vector<1x32xf32> to vector<32x32xf32>
    %245 = arith.addf %242, %244 : vector<32x32xf32>
    %246 = arith.addf %233, %245 : vector<32x32xf32>
    %247 = vector.extract_strided_slice %3 {offsets = [2, 64], sizes = [1, 32], strides = [1, 1]} : vector<8x128xf32> to vector<1x32xf32>
    %248 = vector.extract_strided_slice %3 {offsets = [2, 96], sizes = [1, 32], strides = [1, 1]} : vector<8x128xf32> to vector<1x32xf32>
    %cst_55 = arith.constant dense<0.000000e+00> : vector<32xf32>
    %249 = vector.multi_reduction <add>, %246, %cst_55 [1] : vector<32x32xf32> to vector<32xf32>
    %250 = vector.shape_cast %249 : vector<32xf32> to vector<32x1xf32>
    %cst_56 = arith.constant 3.200000e+01 : f32
    %251 = vector.broadcast %cst_56 : f32 to vector<32x1xf32>
    %252 = arith.divf %250, %251 : vector<32x1xf32>
    %253 = vector.broadcast %252 : vector<32x1xf32> to vector<32x32xf32>
    %254 = arith.subf %246, %253 : vector<32x32xf32>
    %255 = arith.mulf %254, %254 : vector<32x32xf32>
    %cst_57 = arith.constant dense<0.000000e+00> : vector<32xf32>
    %256 = vector.multi_reduction <add>, %255, %cst_57 [1] : vector<32x32xf32> to vector<32xf32>
    %257 = vector.shape_cast %256 : vector<32xf32> to vector<32x1xf32>
    %cst_58 = arith.constant 3.200000e+01 : f32
    %258 = vector.broadcast %cst_58 : f32 to vector<32x1xf32>
    %259 = arith.divf %257, %258 : vector<32x1xf32>
    %260 = vector.broadcast %252 : vector<32x1xf32> to vector<32x32xf32>
    %261 = arith.subf %246, %260 : vector<32x32xf32>
    %cst_59 = arith.constant 9.99999974E-6 : f32
    %262 = vector.broadcast %cst_59 : f32 to vector<32x1xf32>
    %263 = arith.addf %259, %262 : vector<32x1xf32>
    %264 = math.rsqrt %263 : vector<32x1xf32>
    %265 = vector.broadcast %264 : vector<32x1xf32> to vector<32x32xf32>
    %266 = arith.mulf %261, %265 : vector<32x32xf32>
    %267 = vector.broadcast %247 : vector<1x32xf32> to vector<32x32xf32>
    %268 = arith.mulf %266, %267 : vector<32x32xf32>
    %269 = vector.broadcast %248 : vector<1x32xf32> to vector<32x32xf32>
    %270 = arith.addf %268, %269 : vector<32x32xf32>
    %c0_60 = arith.constant 0 : index
    %c0_61 = arith.constant 0 : index
    %271 = vector.load %arg4[%c0_60, %c0_61] : memref<32x32xf32, #tpu.memory_space<vmem>>, vector<32x32xf32>
    tpu.vector_store %arg4[%c0_60, %c0_61], %270 {strides = array<i32>} : memref<32x32xf32, #tpu.memory_space<vmem>>, vector<32x32xf32>,
    return
  }
}

</mosaic_0001>

<bundles_post_ra>
// kernel: decoder_layer.1
= control target key start
LH: loop header
LB: loop body
LE: loop exit
PB: predicated region body
PF: predicated region fallthrough
CT: control target
= control target key end

     0   :  { %vm3025_vm0 = vcmask 261120   ;;  %v36_v10 = vlaneseq  ;;  %s2185_s10 = smov 64   ;;  %v2186_v24 = vmov 0.0   ;;  %s2187_s11 = smov 96   ;;  %vm3023_vm1 = vmmov 0   ;;  %s3015_s1 = inlined_call_operand.vmem [shape: f32[32,128], index: 1, kind: input, shape index: {}]   ;;  %s3016_s0 = inlined_call_operand.vmem [shape: f32[48,64], index: 0, kind: input, shape index: {}]   ;;  %s3017_s3 = inlined_call_operand.vmem [shape: f32[8,128], index: 3, kind: input, shape index: {}]   ;;  %s3018_s2 = inlined_call_operand.vmem [shape: f32[64,128], index: 2, kind: input, shape index: {}]   ;;  %s3019_s4 = inlined_call_operand.vmem [shape: f32[32,32], index: 4, kind: output, shape index: {}]  }
   0x1   :  { %v26_v0 = vld [vmem:[%s3015_s1 + $0x18] sm:$0xff]  ;;  %v25_v1 = vld [vmem:[%s3015_s1 + $0x10] sm:$0xff]  ;;  %v2236_v2 = vld [vmem:[%s3016_s0] sm:$0xff]  ;;  %1983 = vmatprep.subr.mxu1 %v2186_v24  ;;  %1995 = vmatprep.mubr.msk.f32.mxu1 %vm3023_vm1, %v2186_v24  ;;  %vm3026_vm2 = vcmask 130048   ;;  %vm166_vm3 = vcmask 1040384   ;;  %s2189_s12 = smov 111  }
   0x2   :  { %1966 = vmatprep.subr.mxu0 %v26_v0  ;;  %v24_v3 = vld [vmem:[%s3015_s1 + $0x8] sm:$0xff]  ;;  %1974 = vmatprep.mubr.msk.f32.mxu0 %vm3025_vm0, %v2236_v2  ;;  %v23_v4 = vld [vmem:[%s3015_s1] sm:$0xff]  ;;  %v2254_v6 = vld [vmem:[%s3016_s0 + $0x10] sm:$0xff]  ;;  %v2276_v11 = vshrl.u32 %v36_v10, 7  ;;  %s2190_s13 = smov 95   ;;  %vm3021_vm4 = vcmask 121856  }
   0x3   :  { %1967 = vmatpush3.msra.mxu0 %v26_v0  ;;  %v2249_v5 = vld [vmem:[%s3016_s0 + $0x8] sm:$0xff]  ;;  %v2263_v7 = vld [vmem:[%s3016_s0 + $0x18] sm:$0xff]  ;;  %v21_v8 = vld [vmem:[%s3016_s0 + $0x20] sm:$0xff]  ;;  %s2191_s14 = smov 14   ;;  %s2192_s15 = smov 126   ;;  %vm3020_vm9 = vcmask 113664  }
   0x4   :  { %1968 = vmatprep.subr.mxu0 %v25_v1  ;;  %v22_v9 = vld [vmem:[%s3016_s0 + $0x28] sm:$0xff]  ;;  %v2279_v12 = vsub.s32 0, %v2276_v11  ;;  %v35_v13 = vld [vmem:[%s3017_s3] sm:$0xff]  ;;  %v2347_v46 = vsub.s32 1, %v2276_v11  ;;  %v2372_v60 = vadd.s32 8, %v2276_v11  ;;  %v2376_v62 = vadd.s32 16, %v2276_v11 }
   0x5   :  { %1969 = vmatpush3.msra.mxu0 %v25_v1  ;;  %v161_v36 = vrot.slane %v35_v13, 1  ;;  %s2193_s16 = smov 12   ;;  %s2194_s17 = smov 124   ;;  %vm3022_vm14 = vcmask 97280  }
   0x6   :  { %1970 = vmatprep.subr.mxu0 %v24_v3  ;;  %v39_v15 = vrot.slane %v35_v13, %v2279_v12  ;;  %v330_v61 = vand.u32 15, %v2372_v60  ;;  %s2195_s18 = smov 8   ;;  %s2196_s19 = smov 120  }
   0x7   :  { %1971 = vmatpush3.msra.mxu0 %v24_v3  ;;  %v323_v3 = vand.u32 15, %v2276_v11  ;;  %s2197_s20 = smov 16   ;;  %s2198_s21 = smov 80  }
   0x8   :  { %1972 = vmatprep.subr.mxu0 %v23_v4  ;;  %v2380_v1 = vsub.s32 15, %v330_v61  ;;  %s2199_s22 = smov 112   ;;  %s2200_s23 = smov 48  }
   0x9   :  { %1973 = vmatpush3.msra.mxu0 %v23_v4  ;;  %v337_v4 = vand.u32 15, %v2376_v62 }
   0xa   :  { %1975 = vmatmul.mubr.msk.f32.vlgmr.msra.gmra.mxu0 %vm3025_vm0, %v2249_v5 }
   0xb   :  { %1977 = vmatprep.mubr.msk.f32.mxu0 %vm3025_vm0, %v2254_v6 }
   0xe   :  { %1978 = vmatmul.mubr.msk.f32.gmra.mxu0 %vm3025_vm0, %v2263_v7 }
   0xf   :  { %1980 = vmatprep.mubr.msk.f32.mxu0 %vm3025_vm0, %v21_v8 }
  0x12   :  { %1981 = vmatmul.mubr.msk.f32.gmra.mxu0 %vm3025_vm0, %v22_v9 }
  0xca   :  { %v1976_v14 = vpop.f32.mrf.mxu0 }
  0xcb   :  { %v2296_v27 = vadd.f32 %v1976_v14, %v39_v15  ;;  %v2387_v14 = vsub.s32 15, %v323_v3 }
  0xcc   :  { %v125_v16 = vpop.f32.mrf.mxu0 }
  0xcd   :  { %v2285_v17 = vadd.f32 %v125_v16, %v39_v15  ;;  %v2394_v16 = vadd.s32 24, %v2276_v11 }
  0xce   :  { %v1979_v18 = vpop.f32.mrf.mxu0 }
  0xcf   :  { %v2292_v26 = vadd.f32 %v1979_v18, %v39_v15 }
  0xd0   :  { %v135_v19 = vpop.f32.mrf.mxu0 }
  0xd1   :  { %v2287_v20 = vadd.f32 %v135_v19, %v39_v15 }
  0xd2   :  { %v1982_v21 = vpop.f32.mrf.mxu0 }
  0xd3   :  { %v151_v22 = vadd.f32 %v1982_v21, %v39_v15 }
  0xd4   :  { %v145_v23 = vpop.f32.mrf.mxu0 }
  0xd5   :  { %158 = vrot.lane.b32.xlu0 %v151_v22, %s2185_s10  ;;  %v146_v25 = vadd.f32 %v145_v23, %v39_v15  ;;  %v2391_v15 = vsub.s32 15, %v337_v4  ;;  %v406_v22 = vand.u32 1, %v2387_v14 }
  0xd7   :  { %v408_v23 = vand.u32 1, %v2391_v15  ;;  %vm2408_vm6 = vcmp.ne.s32.totalorder %v406_v22, 0 }
  0xd9   :  { %156 = vrot.lane.b32.xlu0 %v146_v25, %s2185_s10  ;;  %v344_v25 = vand.u32 15, %v2394_v16  ;;  %vm2412_vm7 = vcmp.ne.s32.totalorder %v408_v23, 0 }
  0xdd   :  { %178 = vrot.lane.b32.xlu0 %v2292_v26, %s2187_s11 }
  0xe1   :  { %174 = vrot.lane.b32.xlu0 %v2296_v27, %s2187_s11 }
  0xe5   :  { %163 = vrot.lane.b32.xlu0 %v35_v13, %s2187_s11  ;;  %v407_v13 = vand.u32 1, %v2380_v1 }
  0xe7   :  { %vm2396_vm5 = vcmp.ne.s32.totalorder %v407_v13, 0 }
 0x147   :  { %v2301_v28 = vpop.permute.xlu0 %158 }
 0x148   :  { %182 = vrot.lane.b32.xlu1 %v2301_v28, %s2187_s11 }
 0x14b   :  { %v2305_v29 = vpop.permute.xlu0 %156 }
 0x14c   :  { %180 = vrot.lane.b32.xlu1 %v2305_v29, %s2187_s11 }
 0x14f   :  { %v179_v32 = vpop.permute.xlu0 %178 }
 0x150   :  { %176 = vrot.lane.b32.xlu1 %v2287_v20, %s2187_s11 }
 0x153   :  { %v175_v34 = vpop.permute.xlu0 %174 }
 0x154   :  { %172 = vrot.lane.b32.xlu1 %v2285_v17, %s2187_s11 }
 0x157   :  { %v164_v37 = vpop.permute.xlu0 %163 }
 0x158   :  { %v2340_v38 = vsel %vm166_vm3, %v161_v36, %v164_v37  ;;  %v2418_v36 = vsub.s32 15, %v344_v25 }
 0x1ba   :  { %v183_v30 = vpop.permute.xlu1 %182 }
 0x1bb   :  { %1984 = vmatpush3.xpose.msk.msra.mxu1 %vm3026_vm2, %v183_v30 }
 0x1bc   :  { %1985 = vmatprep.subr.mxu1 %v2186_v24 }
 0x1be   :  { %v181_v31 = vpop.permute.xlu1 %180 }
 0x1bf   :  { %1986 = vmatpush3.xpose.msk.msra.mxu1 %vm3026_vm2, %v181_v31 }
 0x1c0   :  { %1987 = vmatprep.subr.mxu1 %v2186_v24 }
 0x1c2   :  { %v177_v33 = vpop.permute.xlu1 %176 }
 0x1c3   :  { %1988 = vmatpush3.xpose.msk.msra.mxu1 %vm3026_vm2, %v179_v32 }
 0x1c4   :  { %1989 = vmatprep.subr.mxu1 %v2186_v24 }
 0x1c6   :  { %v173_v35 = vpop.permute.xlu1 %172 }
 0x1c7   :  { %1990 = vmatpush3.xpose.msk.msra.mxu1 %vm3026_vm2, %v177_v33 }
 0x1c8   :  { %1991 = vmatprep.subr.mxu1 %v2186_v24 }
 0x1cb   :  { %1992 = vmatpush3.xpose.msk.msra.mxu1 %vm3026_vm2, %v175_v34 }
 0x1cc   :  { %1993 = vmatprep.subr.mxu1 %v2186_v24 }
 0x1cf   :  { %1994 = vmatpush3.xpose.msk.msra.mxu1 %vm3026_vm2, %v173_v35 }
 0x1d2   :  { %1996 = vmatmul.mubr.msk.f32.vlgmr.msra.gmra.mxu1 %vm3026_vm2, %v2285_v17 }
 0x1d3   :  { %1998 = vmatprep.mubr.msk.f32.mxu1 %vm3023_vm1, %v2186_v24 }
 0x1d6   :  { %1999 = vmatmul.mubr.msk.f32.gmra.mxu1 %vm3026_vm2, %v2296_v27 }
 0x1d7   :  { %2001 = vmatprep.mubr.msk.f32.mxu1 %vm3023_vm1, %v2186_v24 }
 0x1da   :  { %2002 = vmatmul.mubr.msk.f32.gmra.mxu1 %vm3026_vm2, %v2287_v20 }
 0x1db   :  { %2004 = vmatprep.mubr.msk.f32.mxu1 %vm3023_vm1, %v2186_v24 }
 0x1de   :  { %2005 = vmatmul.mubr.msk.f32.gmra.mxu1 %vm3026_vm2, %v2292_v26 }
 0x1df   :  { %2007 = vmatprep.mubr.msk.f32.mxu1 %vm3023_vm1, %v2186_v24 }
 0x1e2   :  { %2008 = vmatmul.mubr.msk.f32.gmra.mxu1 %vm3026_vm2, %v2340_v38  ;;  %vm3040_vm2 = vcmask 1046528  }
 0x292   :  { %v274_v39 = vpop.f32.mrf.mxu1 }
 0x294   :  { %v1997_v40 = vpop.f32.mrf.mxu1 }
 0x296   :  { %v279_v41 = vpop.f32.mrf.mxu1 }
 0x298   :  { %v2000_v42 = vpop.f32.mrf.mxu1 }
 0x29a   :  { %v284_v43 = vpop.f32.mrf.mxu1 }
 0x29c   :  { %v2003_v44 = vpop.f32.mrf.mxu1 }
 0x29d   :  { %v409_v44 = vand.u32 1, %v2418_v36 }
 0x29e   :  { %v289_v45 = vpop.f32.mrf.mxu1 }
 0x29f   :  { %vm2432_vm8 = vcmp.ne.s32.totalorder %v409_v44, 0 }
 0x2a0   :  { %v2006_v47 = vpop.f32.mrf.mxu1 }
 0x2a2   :  { %v294_v48 = vpop.f32.mrf.mxu1 }
 0x2a3   :  { %v301_v49 = vrot.slane %v294_v48, %v2279_v12  ;;  %v309_v50 = vrot.slane %v294_v48, %v2347_v46 }
 0x2a4   :  { %v2009_v51 = vpop.f32.mrf.mxu1 }
 0x2a5   :  { %v311_v52 = vadd.f32 %v309_v50, %v279_v41  ;;  %v2353_v53 = vadd.f32 %v301_v49, %v274_v39  ;;  %v2355_v54 = vadd.f32 %v301_v49, %v279_v41  ;;  %v2357_v55 = vadd.f32 %v301_v49, %v284_v43 }
 0x2a6   :  { %v2359_v56 = vadd.f32 %v301_v49, %v289_v45  ;;  %v312_v57 = vadd.f32 %v309_v50, %v284_v43  ;;  %v310_v58 = vadd.f32 %v309_v50, %v274_v39  ;;  %v313_v59 = vadd.f32 %v309_v50, %v289_v45 }
 0x2a7   :  { %391 = vrot.lane.b32.xlu0 %v311_v52, %s2189_s12  ;;  %379 = vrot.lane.b32.xlu1 %v311_v52, %s2190_s13  ;;  %v464_v51 = vand.u32 2, %v2380_v1 }
 0x2a9   :  { %vm2441_vm10 = vcmp.ne.s32.totalorder %v464_v51, 0 }
 0x2ab   :  { %381 = vrot.lane.b32.xlu0 %v312_v57, %s2190_s13  ;;  %377 = vrot.lane.b32.xlu1 %v310_v58, %s2190_s13 }
 0x2af   :  { %393 = vrot.lane.b32.xlu0 %v312_v57, %s2189_s12  ;;  %389 = vrot.lane.b32.xlu1 %v310_v58, %s2189_s12 }
 0x2b3   :  { %414 = vrot.lane.b32.xlu0 %v310_v58, %s2187_s11  ;;  %416 = vrot.lane.b32.xlu1 %v311_v52, %s2187_s11 }
 0x2b7   :  { %383 = vrot.lane.b32.xlu0 %v313_v59, %s2190_s13  ;;  %418 = vrot.lane.b32.xlu1 %v312_v57, %s2187_s11 }
 0x2bb   :  { %420 = vrot.lane.b32.xlu0 %v313_v59, %s2187_s11  ;;  %395 = vrot.lane.b32.xlu1 %v313_v59, %s2189_s12 }
 0x319   :  { %v392_v63 = vpop.permute.xlu0 %391  ;;  %v380_v0 = vpop.permute.xlu1 %379 }
 0x31a   :  { %v403_v30 = vsel %vm3021_vm4, %v380_v0, %v392_v63  ;;  %v465_v0 = vand.u32 2, %v2391_v15 }
 0x31c   :  { %vm2452_vm11 = vcmp.ne.s32.totalorder %v465_v0, 0 }
 0x31d   :  { %v382_v8 = vpop.permute.xlu0 %381  ;;  %v378_v9 = vpop.permute.xlu1 %377 }
 0x321   :  { %v394_v18 = vpop.permute.xlu0 %393  ;;  %v390_v19 = vpop.permute.xlu1 %389 }
 0x322   :  { %v404_v37 = vsel %vm3021_vm4, %v382_v8, %v394_v18  ;;  %v402_v39 = vsel %vm3021_vm4, %v378_v9, %v390_v19  ;;  %v463_v8 = vand.u32 2, %v2387_v14 }
 0x324   :  { %vm2456_vm12 = vcmp.ne.s32.totalorder %v463_v8, 0  ;;  %v3059_v8 = vmov 0 }
 0x325   :  { %v415_v31 = vpop.permute.xlu0 %414  ;;  %v417_v32 = vpop.permute.xlu1 %416 }
 0x326   :  { %v427_v33 = vsel %vm2396_vm5, %v403_v30, %v417_v32  ;;  %v426_v42 = vsel %vm2408_vm6, %v402_v39, %v415_v31 }
 0x327   :  { %448 = vrot.lane.b32.xlu0 %v427_v33, %s2191_s14  ;;  %436 = vrot.lane.b32.xlu1 %v427_v33, %s2192_s15 }
 0x329   :  { %v384_v40 = vpop.permute.xlu0 %383  ;;  %v419_v41 = vpop.permute.xlu1 %418 }
 0x32a   :  { %v428_v43 = vsel %vm2412_vm7, %v404_v37, %v419_v41  ;;  %v466_v37 = vand.u32 2, %v2418_v36 }
 0x32b   :  { %434 = vrot.lane.b32.xlu1 %v426_v42, %s2192_s15  ;;  %438 = vrot.lane.b32.xlu0 %v428_v43, %s2192_s15 }
 0x32c   :  { %vm2472_vm13 = vcmp.ne.s32.totalorder %v466_v37, 0 }
 0x32d   :  { %v396_v45 = vpop.permute.xlu1 %395  ;;  %v421_v47 = vpop.permute.xlu0 %420 }
 0x32e   :  { %v405_v48 = vsel %vm3021_vm4, %v384_v40, %v396_v45 }
 0x32f   :  { %446 = vrot.lane.b32.xlu1 %v426_v42, %s2191_s14  ;;  %450 = vrot.lane.b32.xlu0 %v428_v43, %s2191_s14  ;;  %v429_v50 = vsel %vm2432_vm8, %v405_v48, %v421_v47 }
 0x333   :  { %452 = vrot.lane.b32.xlu0 %v429_v50, %s2191_s14  ;;  %440 = vrot.lane.b32.xlu1 %v429_v50, %s2192_s15 }
 0x399   :  { %v449_v57 = vpop.permute.xlu0 %448  ;;  %v437_v58 = vpop.permute.xlu1 %436 }
 0x39a   :  { %v460_v59 = vsel %vm3020_vm9, %v437_v58, %v449_v57  ;;  %v508_v58 = vand.u32 4, %v2387_v14 }
 0x39b   :  { %v472_v63 = vsel %vm2441_vm10, %v460_v59, %v427_v33 }
 0x39c   :  { %493 = vrot.lane.b32.xlu0 %v472_v63, %s2193_s16  ;;  %481 = vrot.lane.b32.xlu1 %v472_v63, %s2194_s17 }
 0x39d   :  { %v439_v9 = vpop.permute.xlu0 %438  ;;  %v435_v13 = vpop.permute.xlu1 %434 }
 0x3a1   :  { %v451_v22 = vpop.permute.xlu0 %450  ;;  %v447_v23 = vpop.permute.xlu1 %446 }
 0x3a2   :  { %v461_v30 = vsel %vm3020_vm9, %v439_v9, %v451_v22  ;;  %v459_v31 = vsel %vm3020_vm9, %v435_v13, %v447_v23  ;;  %v3061_v9 = vmov 0 }
 0x3a3   :  { %v473_v32 = vsel %vm2452_vm11, %v461_v30, %v428_v43  ;;  %v471_v33 = vsel %vm2456_vm12, %v459_v31, %v426_v42  ;;  %v509_v43 = vand.u32 4, %v2380_v1  ;;  %v511_v31 = vand.u32 4, %v2418_v36 }
 0x3a4   :  { %483 = vrot.lane.b32.xlu0 %v473_v32, %s2194_s17  ;;  %479 = vrot.lane.b32.xlu1 %v471_v33, %s2194_s17 }
 0x3a5   :  { %v453_v39 = vpop.permute.xlu0 %452  ;;  %v441_v40 = vpop.permute.xlu1 %440  ;;  %vm2481_vm15 = vcmp.ne.s32.totalorder %v509_v43, 0  ;;  %vm2512_vm4 = vcmp.ne.s32.totalorder %v511_v31, 0  ;;  %v554_v43 = vand.u32 8, %v2380_v1 }
 0x3a6   :  { %v462_v41 = vsel %vm3020_vm9, %v441_v40, %v453_v39  ;;  %vm2496_vm9 = vcmp.ne.s32.totalorder %v508_v58, 0 }
 0x3a7   :  { %v474_v42 = vsel %vm2472_vm13, %v462_v41, %v429_v50  ;;  %v510_v50 = vand.u32 4, %v2391_v15  ;;  %v3062_v9 = vsel %vm2496_vm9, 4294967295, %v3061_v9  ;;  %v3063_v41 = vmov 0 }
 0x3a8   :  { %495 = vrot.lane.b32.xlu0 %v473_v32, %s2193_s16  ;;  %491 = vrot.lane.b32.xlu1 %v471_v33, %s2193_s16  ;;  %v3064_v41 = vsel %vm2512_vm4, 4294967295, %v3063_v41  ;;  %vm2523_vm1 = vcmp.ne.s32.totalorder %v554_v43, 0 }
 0x3a9   :  { %vm2492_vm3 = vcmp.ne.s32.totalorder %v510_v50, 0  ;;  %v3065_v50 = vmov 0 }
 0x3aa   :  { %v3060_v8 = vsel %vm2492_vm3, 4294967295, %v3059_v8  ;;  %v3066_v50 = vsel %vm2523_vm1, 4294967295, %v3065_v50 }
 0x3ac   :  { %497 = vrot.lane.b32.xlu0 %v474_v42, %s2193_s16  ;;  %485 = vrot.lane.b32.xlu1 %v474_v42, %s2194_s17 }
 0x40e   :  { %v494_v47 = vpop.permute.xlu0 %493  ;;  %v482_v48 = vpop.permute.xlu1 %481 }
 0x40f   :  { %v505_v51 = vsel %vm3022_vm14, %v482_v48, %v494_v47  ;;  %v368_v48 = vand.u32 127, %v36_v10  ;;  %v556_v10 = vand.u32 8, %v2418_v36 }
 0x410   :  { %v517_v57 = vsel %vm2481_vm15, %v505_v51, %v472_v63  ;;  %v555_v51 = vand.u32 8, %v2391_v15 }
 0x411   :  { %538 = vrot.lane.b32.xlu0 %v517_v57, %s2195_s18  ;;  %526 = vrot.lane.b32.xlu1 %v517_v57, %s2196_s19  ;;  %v2541_v15 = vsub.s32 %v368_v48, %v330_v61 }
 0x412   :  { %vm2534_vm0 = vcmp.ne.s32.totalorder %v555_v51, 0 }
 0x416   :  { %v484_v59 = vpop.permute.xlu0 %483  ;;  %v480_v0 = vpop.permute.xlu1 %479 }
 0x41a   :  { %v496_v63 = vpop.permute.xlu0 %495  ;;  %v492_v13 = vpop.permute.xlu1 %491 }
 0x41b   :  { %v506_v22 = vsel %vm3022_vm14, %v484_v59, %v496_v63  ;;  %v504_v23 = vsel %vm3022_vm14, %v480_v0, %v492_v13  ;;  %v2530_v0 = vsub.s32 %v368_v48, %v323_v3  ;;  %v3067_v63 = vmov 0 }
 0x41c   :  { %v518_v30 = vsel %vm2492_vm3, %v506_v22, %v473_v32  ;;  %v516_v14 = vsel %vm2496_vm9, %v504_v23, %v471_v33  ;;  %v3068_v63 = vsel %vm2534_vm0, 4294967295, %v3067_v63  ;;  %vm3033_vm3 = vcmp.eq.s32.totalorder %v2541_v15, 1 }
 0x41d   :  { %528 = vrot.lane.b32.xlu0 %v518_v30, %s2196_s19  ;;  %524 = vrot.lane.b32.xlu1 %v516_v14, %s2196_s19  ;;  %vm3039_vm9 = vcmp.le.s32.totalorder %v2530_v0, 0 }
 0x41e   :  { %v498_v37 = vpop.permute.xlu0 %497  ;;  %v486_v39 = vpop.permute.xlu1 %485 }
 0x41f   :  { %v507_v40 = vsel %vm3022_vm14, %v486_v39, %v498_v37  ;;  %vm3031_vm14 = vcmask 64512  }
 0x420   :  { %v519_v32 = vsel %vm2512_vm4, %v507_v40, %v474_v42  ;;  %vm2548_vm4 = vcmp.ne.s32.totalorder %v556_v10, 0 }
 0x421   :  { %540 = vrot.lane.b32.xlu0 %v518_v30, %s2195_s18  ;;  %536 = vrot.lane.b32.xlu1 %v516_v14, %s2195_s18 }
 0x425   :  { %542 = vrot.lane.b32.xlu0 %v519_v32, %s2195_s18  ;;  %530 = vrot.lane.b32.xlu1 %v519_v32, %s2196_s19 }
 0x483   :  { %v539_v33 = vpop.permute.xlu0 %538  ;;  %v527_v47 = vpop.permute.xlu1 %526 }
 0x484   :  { %v550_v58 = vsel %vm3031_vm14, %v527_v47, %v539_v33  ;;  %v2566_v47 = vsub.s32 %v368_v48, %v344_v25 }
 0x485   :  { %v562_v1 = vsel %vm2523_vm1, %v550_v58, %v517_v57  ;;  %vm3071_vm1 = vcmask 64512  }
 0x486   :  { %v571_v14 = vrot.slane %v562_v1, 1 }
 0x48f   :  { %v529_v42 = vpop.permute.xlu0 %528  ;;  %v525_v59 = vpop.permute.xlu1 %524 }
 0x493   :  { %v541_v13 = vpop.permute.xlu0 %540  ;;  %v537_v22 = vpop.permute.xlu1 %536 }
 0x494   :  { %v551_v23 = vsel %vm3031_vm14, %v529_v42, %v541_v13  ;;  %v549_v3 = vsel %vm3031_vm14, %v525_v59, %v537_v22  ;;  %vm3034_vm14 = vcmp.le.s32.totalorder %v2541_v15, 0 }
 0x495   :  { %v563_v57 = vsel %vm2534_vm0, %v551_v23, %v518_v30  ;;  %v570_v31 = vrot.slane %v549_v3, 1  ;;  %v2558_v30 = vsub.s32 %v368_v48, %v337_v4  ;;  %vm3072_vm0 = vcmp.eq.s32.totalorder %v2530_v0, 1 }
 0x496   :  { %v573_v37 = vrot.slane %v563_v57, 1 }
 0x497   :  { %v543_v60 = vpop.permute.xlu0 %542  ;;  %v531_v61 = vpop.permute.xlu1 %530  ;;  %v572_v39 = vsel %vm3040_vm2, %v570_v31, %v571_v14 }
 0x498   :  { %v552_v40 = vsel %vm3071_vm1, %v531_v61, %v543_v60  ;;  %v595_v33 = vsel %vm3072_vm0, 0.0, %v572_v39  ;;  %v574_v43 = vsel %vm3040_vm2, %v571_v14, %v573_v37  ;;  %vm3037_vm0 = vcmp.eq.s32.totalorder %v2558_v30, 1 }
 0x499   :  { %v564_v51 = vsel %vm2548_vm4, %v552_v40, %v519_v32  ;;  %v599_v58 = vsel %vm3039_vm9, %v549_v3, %v595_v33  ;;  %v596_v62 = vsel %vm3033_vm3, 0.0, %v574_v43  ;;  %vm3038_vm1 = vcmp.eq.s32.totalorder %v2566_v47, 1 }
 0x49a   :  { %v575_v4 = vrot.slane %v564_v51, 1  ;;  %607 = vrot.lane.b32.xlu1 %v599_v58, %s2197_s20  ;;  %v600_v42 = vsel %vm3034_vm14, %v562_v1, %v596_v62  ;;  %vm3035_vm3 = vcmp.le.s32.totalorder %v2558_v30, 0  ;;  %vm3036_vm14 = vcmp.le.s32.totalorder %v2566_v47, 0 }
 0x49b   :  { %609 = vrot.lane.b32.xlu0 %v600_v42, %s2197_s20 }
 0x49c   :  { %v576_v16 = vsel %vm3040_vm2, %v573_v37, %v575_v4  ;;  %v582_v25 = vsel %vm3040_vm2, %v575_v4, %v570_v31 }
 0x49d   :  { %v597_v32 = vsel %vm3037_vm0, 0.0, %v576_v16  ;;  %v598_v48 = vsel %vm3038_vm1, 0.0, %v582_v25  ;;  %vm3075_vm0 = vcmask 261120  }
 0x49e   :  { %631 = vrot.lane.b32.xlu1 %v2236_v2, %s2187_s11  ;;  %v601_v59 = vsel %vm3035_vm3, %v563_v57, %v597_v32  ;;  %v602_v2 = vsel %vm3036_vm14, %v564_v51, %v598_v48  ;;  %vm3073_vm3 = vcmask 130048  }
 0x49f   :  { %633 = vrot.lane.b32.xlu0 %v2249_v5, %s2187_s11  ;;  %vm3074_vm14 = vmmov %vm3073_vm3 }
 0x4a0   :  { %vm3077_vm1 = vmmov %vm3073_vm3 }
 0x4a2   :  { %611 = vrot.lane.b32.xlu1 %v601_v59, %s2197_s20 }
 0x4a3   :  { %613 = vrot.lane.b32.xlu0 %v602_v2, %s2197_s20 }
 0x4a6   :  { %635 = vrot.lane.b32.xlu1 %v2254_v6, %s2187_s11 }
 0x4a7   :  { %637 = vrot.lane.b32.xlu0 %v2263_v7, %s2187_s11 }
 0x4aa   :  { %695 = vrot.lane.b32.xlu1 %v2287_v20, %s2185_s10 }
 0x4ab   :  { %697 = vrot.lane.b32.xlu0 %v2292_v26, %s2185_s10 }
 0x4ae   :  { %693 = vrot.lane.b32.xlu1 %v2296_v27, %s2185_s10 }
 0x4af   :  { %691 = vrot.lane.b32.xlu0 %v2285_v17, %s2185_s10 }
 0x4b2   :  { %820 = vrot.lane.b32.xlu1 %v2301_v28, %s2198_s21 }
 0x50c   :  { %v608_v5 = vpop.permute.xlu1 %607 }
 0x50d   :  { %v619_v6 = vsel %vm3073_vm3, %v599_v58, %v608_v5  ;;  %v610_v7 = vpop.permute.xlu0 %609 }
 0x50e   :  { %v623_v1 = vadd.f32 %v619_v6, %v2353_v53  ;;  %v620_v10 = vsel %vm3074_vm14, %v600_v42, %v610_v7  ;;  %vm3076_vm14 = vmmov %vm3075_vm0 }
 0x50f   :  { %v624_v13 = vadd.f32 %v620_v10, %v2355_v54 }
 0x510   :  { %v627_v22 = vmul.f32 0.25, %v623_v1  ;;  %v2616_v23 = vpop.permute.xlu1 %631 }
 0x511   :  { %v628_v3 = vmul.f32 0.25, %v624_v13  ;;  %v2618_v14 = vpop.permute.xlu0 %633 }
 0x512   :  { %v643_v57 = vadd.f32 %v2616_v23, %v627_v22 }
 0x513   :  { %v644_v28 = vadd.f32 %v2618_v14, %v628_v3 }
 0x514   :  { %v612_v31 = vpop.permute.xlu1 %611  ;;  %v647_v37 = vsel %vm3075_vm0, %v643_v57, -inf }
 0x515   :  { %v621_v60 = vsel %vm3073_vm3, %v601_v59, %v612_v31  ;;  %v614_v53 = vpop.permute.xlu0 %613  ;;  %648 = vmax.xlane.f32.xlu1 %v647_v37  ;;  %v650_v61 = vsel %vm3076_vm14, %v644_v28, -inf  ;;  %vm3078_vm3 = vmmov %vm3075_vm0 }
 0x516   :  { %v625_v54 = vadd.f32 %v621_v60, %v2357_v55  ;;  %v622_v39 = vsel %vm3077_vm1, %v602_v2, %v614_v53  ;;  %651 = vmax.xlane.f32.xlu0 %v650_v61  ;;  %vm3079_vm1 = vmmov %vm3075_vm0 }
 0x517   :  { %v626_v40 = vadd.f32 %v622_v39, %v2359_v56  ;;  %vm3080_vm14 = vmmov %vm3075_vm0 }
 0x518   :  { %v629_v33 = vmul.f32 0.25, %v625_v54  ;;  %v2628_v43 = vpop.permute.xlu1 %635 }
 0x519   :  { %v630_v51 = vmul.f32 0.25, %v626_v40  ;;  %v2630_v58 = vpop.permute.xlu0 %637 }
 0x51a   :  { %v645_v62 = vadd.f32 %v2628_v43, %v629_v33 }
 0x51b   :  { %v646_v4 = vadd.f32 %v2630_v58, %v630_v51 }
 0x51c   :  { %v696_v42 = vpop.permute.xlu1 %695  ;;  %v653_v16 = vsel %vm3075_vm0, %v645_v62, -inf }
 0x51d   :  { %v698_v25 = vpop.permute.xlu0 %697  ;;  %654 = vmax.xlane.f32.xlu0 %v653_v16  ;;  %v656_v55 = vsel %vm3078_vm3, %v646_v4, -inf  ;;  %vm3081_vm3 = vmmov %vm3075_vm0 }
 0x51e   :  { %2010 = vmatprep.subr.mxu0 %v698_v25  ;;  %657 = vmax.xlane.f32.xlu1 %v656_v55 }
 0x51f   :  { %2011 = vmatpush3.msra.mxu0 %v698_v25 }
 0x520   :  { %2012 = vmatprep.subr.mxu0 %v696_v42  ;;  %v694_v56 = vpop.permute.xlu1 %693 }
 0x521   :  { %2013 = vmatpush3.msra.mxu0 %v696_v42  ;;  %v692_v32 = vpop.permute.xlu0 %691 }
 0x522   :  { %2014 = vmatprep.subr.mxu0 %v694_v56 }
 0x523   :  { %2015 = vmatpush3.msra.mxu0 %v694_v56 }
 0x524   :  { %2016 = vmatprep.subr.mxu0 %v692_v32  ;;  %v821_v48 = vpop.permute.xlu1 %820 }
 0x525   :  { %2017 = vmatpush3.msra.mxu0 %v692_v32 }
 0x526   :  { %2024 = vmatprep.subr.mxu0 %v2186_v24 }
 0x52f   :  { %816 = vrot.lane.b32.xlu1 %v2292_v26, %s2198_s21 }
 0x533   :  { %818 = vrot.lane.b32.xlu0 %v2305_v29, %s2198_s21 }
 0x59e   :  { %v649_v59 = vpop.xlane.xlu1 %648 }
 0x59f   :  { %v659_v2 = vsub.f32 %v643_v57, %v649_v59  ;;  %v652_v5 = vpop.xlane.xlu0 %651 }
 0x5a0   :  { %v660_v6 = vsub.f32 %v644_v28, %v652_v5 }
 0x5a1   :  { %v663_v7 = vmul.f32 1.442695, %v659_v2 }
 0x5a2   :  { %v665_v1 = vmul.f32 1.442695, %v660_v6 }
 0x5a3   :  { %2132 = vpow2.f32 %v663_v7 }
 0x5a4   :  { %2134 = vpow2.f32 %v665_v1 }
 0x5a6   :  { %v655_v29 = vpop.xlane.xlu0 %654 }
 0x5a7   :  { %v658_v57 = vpop.xlane.xlu1 %657  ;;  %v661_v28 = vsub.f32 %v645_v62, %v655_v29 }
 0x5a8   :  { %v662_v31 = vsub.f32 %v646_v4, %v658_v57 }
 0x5a9   :  { %v667_v37 = vmul.f32 1.442695, %v661_v28 }
 0x5aa   :  { %v669_v60 = vmul.f32 1.442695, %v662_v31  ;;  %v819_v40 = vpop.permute.xlu0 %818 }
 0x5ab   :  { %2136 = vpow2.f32 %v667_v37  ;;  %v817_v33 = vpop.permute.xlu1 %816 }
 0x5ac   :  { %2138 = vpow2.f32 %v669_v60 }
 0x5b0   :  { %v2133_v10 = vpop.eup %2132 }
 0x5b1   :  { %v2135_v13 = vpop.eup %2134  ;;  %v671_v22 = vsel %vm3079_vm1, %v2133_v10, 0.0  ;;  %vm3082_vm1 = vmmov %vm3075_vm0 }
 0x5b2   :  { %672 = vadd.xlane.f32.xlu0 %v671_v22  ;;  %v674_v3 = vsel %vm3080_vm14, %v2135_v13, 0.0  ;;  %vm3083_vm14 = vmmov %vm3075_vm0 }
 0x5b3   :  { %675 = vadd.xlane.f32.xlu1 %v674_v3 }
 0x5b8   :  { %v2137_v53 = vpop.eup %2136 }
 0x5b9   :  { %v2139_v61 = vpop.eup %2138  ;;  %v677_v54 = vsel %vm3075_vm0, %v2137_v53, 0.0  ;;  %vm3084_vm0 = vcmask 130048  }
 0x5ba   :  { %v680_v39 = vsel %vm3081_vm3, %v2139_v61, 0.0  ;;  %vm3085_vm3 = vmmov %vm3084_vm0 }
 0x5bb   :  { %vm3086_vm9 = vmmov %vm3084_vm0 }
 0x5bc   :  { %vm3087_vm2 = vmmov %vm3084_vm0 }
 0x5c4   :  { %812 = vrot.lane.b32.xlu1 %v2296_v27, %s2198_s21 }
 0x5c8   :  { %814 = vrot.lane.b32.xlu0 %v2287_v20, %s2198_s21 }
 0x5e7   :  { %678 = vadd.xlane.f32.xlu0 %v677_v54 }
 0x5e8   :  { %681 = vadd.xlane.f32.xlu1 %v680_v39 }
 0x5f9   :  { %800 = vrot.lane.b32.xlu1 %v2285_v17, %s2199_s22 }
 0x5fd   :  { %810 = vrot.lane.b32.xlu0 %v2285_v17, %s2198_s21  ;;  %804 = vrot.lane.b32.xlu1 %v2287_v20, %s2199_s22 }
 0x601   :  { %802 = vrot.lane.b32.xlu0 %v2296_v27, %s2199_s22  ;;  %808 = vrot.lane.b32.xlu1 %v2340_v38, %s2199_s22 }
 0x605   :  { %806 = vrot.lane.b32.xlu0 %v2292_v26, %s2199_s22 }
 0x63b   :  { %v673_v51 = vpop.xlane.xlu0 %672 }
 0x63c   :  { %2140 = vrcp.f32 %v673_v51  ;;  %v676_v62 = vpop.xlane.xlu1 %675 }
 0x63d   :  { %2142 = vrcp.f32 %v676_v62 }
 0x63f   :  { %v815_v38 = vpop.permute.xlu0 %814 }
 0x640   :  { %v813_v55 = vpop.permute.xlu1 %812 }
 0x649   :  { %v2141_v4 = vpop.eup %2140 }
 0x64a   :  { %v2143_v42 = vpop.eup %2142  ;;  %v687_v16 = vmul.f32 %v2141_v4, %v2133_v10 }
 0x64b   :  { %v688_v25 = vmul.f32 %v2143_v42, %v2135_v13 }
 0x64c   :  { %2018 = vmatprep.mubr.msk.f32.mxu0 %vm3082_vm1, %v687_v16  ;;  %vm3088_vm1 = vmmov %vm3084_vm0 }
 0x64d   :  { %2019 = vmatmul.mubr.msk.f32.vlgmr.msra.gmra.mxu0 %vm3083_vm14, %v688_v25  ;;  %vm3089_vm14 = vmmov %vm3084_vm0 }
 0x64e   :  { %2025 = vmatpush3.xpose.msk.msra.mxu0 %vm3084_vm0, %v821_v48  ;;  %vm3092_vm0 = vmmov 0  }
 0x64f   :  { %2026 = vmatprep.subr.mxu0 %v2186_v24 }
 0x652   :  { %2027 = vmatpush3.xpose.msk.msra.mxu0 %vm3085_vm3, %v819_v40  ;;  %vm3093_vm3 = vmmov %vm3088_vm1 }
 0x653   :  { %2028 = vmatprep.subr.mxu0 %v2186_v24 }
 0x656   :  { %2029 = vmatpush3.xpose.msk.msra.mxu0 %vm3086_vm9, %v817_v33  ;;  %vm3090_vm9 = vcmask 261120  }
 0x657   :  { %2030 = vmatprep.subr.mxu0 %v2186_v24 }
 0x65a   :  { %2031 = vmatpush3.xpose.msk.msra.mxu0 %vm3087_vm2, %v815_v38  ;;  %vm3091_vm2 = vmmov %vm3090_vm9 }
 0x65b   :  { %2032 = vmatprep.subr.mxu0 %v2186_v24 }
 0x65e   :  { %2033 = vmatpush3.xpose.msk.msra.mxu0 %vm3088_vm1, %v813_v55 }
 0x65f   :  { %2034 = vmatprep.subr.mxu0 %v2186_v24 }
 0x670   :  { %v679_v56 = vpop.xlane.xlu0 %678 }
 0x671   :  { %2144 = vrcp.f32 %v679_v56  ;;  %v682_v32 = vpop.xlane.xlu1 %681 }
 0x672   :  { %2146 = vrcp.f32 %v682_v32 }
 0x674   :  { %v811_v48 = vpop.permute.xlu0 %810 }
 0x675   :  { %2035 = vmatpush3.xpose.msk.msra.mxu0 %vm3089_vm14, %v811_v48  ;;  %v801_v7 = vpop.permute.xlu1 %800  ;;  %vm3094_vm14 = vmmov %vm3088_vm1 }
 0x678   :  { %v803_v1 = vpop.permute.xlu0 %802 }
 0x679   :  { %v805_v10 = vpop.permute.xlu1 %804 }
 0x67c   :  { %v807_v13 = vpop.permute.xlu0 %806 }
 0x67d   :  { %v809_v22 = vpop.permute.xlu1 %808 }
 0x67e   :  { %v2145_v59 = vpop.eup %2144 }
 0x67f   :  { %v2147_v2 = vpop.eup %2146  ;;  %v689_v5 = vmul.f32 %v2145_v59, %v2137_v53 }
 0x680   :  { %v690_v6 = vmul.f32 %v2147_v2, %v2139_v61 }
 0x681   :  { %2021 = vmatprep.mubr.msk.f32.mxu0 %vm3090_vm9, %v689_v5  ;;  %vm3095_vm9 = vmmov %vm3088_vm1 }
 0x682   :  { %2022 = vmatmul.mubr.msk.f32.gmra.mxu0 %vm3091_vm2, %v690_v6  ;;  %vm3096_vm2 = vmmov %vm3088_vm1 }
 0x683   :  { %2036 = vmatprep.mubr.msk.f32.mxu0 %vm3092_vm0, %v2186_v24 }
 0x686   :  { %2037 = vmatmul.mubr.msk.f32.vlgmr.msra.gmra.mxu0 %vm3093_vm3, %v801_v7 }
 0x687   :  { %2039 = vmatprep.mubr.msk.f32.mxu0 %vm3092_vm0, %v2186_v24 }
 0x68a   :  { %2040 = vmatmul.mubr.msk.f32.gmra.mxu0 %vm3088_vm1, %v803_v1 }
 0x68b   :  { %2042 = vmatprep.mubr.msk.f32.mxu0 %vm3092_vm0, %v2186_v24 }
 0x68e   :  { %2043 = vmatmul.mubr.msk.f32.gmra.mxu0 %vm3094_vm14, %v805_v10  ;;  %vm3108_vm14 = vnez %v3060_v8 }
 0x68f   :  { %2045 = vmatprep.mubr.msk.f32.mxu0 %vm3092_vm0, %v2186_v24 }
 0x692   :  { %2046 = vmatmul.mubr.msk.f32.gmra.mxu0 %vm3095_vm9, %v807_v13  ;;  %vm3109_vm9 = vnez %v3062_v9 }
 0x693   :  { %2048 = vmatprep.mubr.msk.f32.mxu0 %vm3092_vm0, %v2186_v24  ;;  %vm3097_vm0 = vcmask 121856  }
 0x694   :  { %vm3098_vm3 = vmmov %vm3097_vm0 }
 0x695   :  { %vm3099_vm1 = vmmov %vm3097_vm0 }
 0x696   :  { %2049 = vmatmul.mubr.msk.f32.gmra.mxu0 %vm3096_vm2, %v809_v22  ;;  %vm3111_vm2 = vnez %v3064_v41 }
 0x70d   :  { %v2686_v3 = vpop.f32.mrf.mxu0 }
 0x70f   :  { %v2688_v29 = vpop.f32.mrf.mxu0 }
 0x742   :  { %v2690_v57 = vpop.f32.mrf.mxu0 }
 0x744   :  { %v2692_v28 = vpop.f32.mrf.mxu0 }
 0x746   :  { %v910_v31 = vpop.f32.mrf.mxu0 }
 0x748   :  { %v2038_v37 = vpop.f32.mrf.mxu0 }
 0x74a   :  { %v915_v60 = vpop.f32.mrf.mxu0 }
 0x74c   :  { %v2041_v53 = vpop.f32.mrf.mxu0 }
 0x74e   :  { %v920_v61 = vpop.f32.mrf.mxu0 }
 0x750   :  { %v2044_v54 = vpop.f32.mrf.mxu0 }
 0x752   :  { %v925_v39 = vpop.f32.mrf.mxu0 }
 0x754   :  { %v2047_v40 = vpop.f32.mrf.mxu0 }
 0x756   :  { %v930_v24 = vpop.f32.mrf.mxu0 }
 0x757   :  { %v937_v33 = vrot.slane %v930_v24, %v2279_v12  ;;  %v945_v51 = vrot.slane %v930_v24, %v2347_v46 }
 0x758   :  { %v2050_v62 = vpop.f32.mrf.mxu0 }
 0x759   :  { %v947_v4 = vadd.f32 %v945_v51, %v915_v60  ;;  %v2696_v42 = vadd.f32 %v937_v33, %v910_v31  ;;  %v2698_v16 = vadd.f32 %v937_v33, %v915_v60  ;;  %v2700_v25 = vadd.f32 %v937_v33, %v925_v39 }
 0x75a   :  { %v2702_v38 = vadd.f32 %v937_v33, %v920_v61  ;;  %v948_v55 = vadd.f32 %v945_v51, %v920_v61  ;;  %v946_v56 = vadd.f32 %v945_v51, %v910_v31  ;;  %v949_v12 = vadd.f32 %v945_v51, %v925_v39 }
 0x75b   :  { %968 = vrot.lane.b32.xlu1 %v947_v4, %s2189_s12  ;;  %956 = vrot.lane.b32.xlu0 %v947_v4, %s2190_s13 }
 0x75f   :  { %958 = vrot.lane.b32.xlu1 %v948_v55, %s2190_s13  ;;  %954 = vrot.lane.b32.xlu0 %v946_v56, %s2190_s13 }
 0x763   :  { %970 = vrot.lane.b32.xlu1 %v948_v55, %s2189_s12  ;;  %966 = vrot.lane.b32.xlu0 %v946_v56, %s2189_s12 }
 0x767   :  { %982 = vrot.lane.b32.xlu1 %v946_v56, %s2187_s11  ;;  %984 = vrot.lane.b32.xlu0 %v947_v4, %s2187_s11 }
 0x76b   :  { %960 = vrot.lane.b32.xlu1 %v949_v12, %s2190_s13  ;;  %986 = vrot.lane.b32.xlu0 %v948_v55, %s2187_s11 }
 0x76f   :  { %988 = vrot.lane.b32.xlu1 %v949_v12, %s2187_s11  ;;  %972 = vrot.lane.b32.xlu0 %v949_v12, %s2189_s12 }
 0x7cd   :  { %v969_v32 = vpop.permute.xlu1 %968  ;;  %v957_v48 = vpop.permute.xlu0 %956 }
 0x7ce   :  { %v979_v7 = vsel %vm3097_vm0, %v957_v48, %v969_v32 }
 0x7d1   :  { %v959_v59 = vpop.permute.xlu1 %958  ;;  %v955_v2 = vpop.permute.xlu0 %954 }
 0x7d5   :  { %v971_v5 = vpop.permute.xlu1 %970  ;;  %v967_v6 = vpop.permute.xlu0 %966 }
 0x7d6   :  { %v980_v22 = vsel %vm3098_vm3, %v959_v59, %v971_v5  ;;  %v978_v31 = vsel %vm3099_vm1, %v955_v2, %v967_v6  ;;  %vm3113_vm3 = vnez %v3066_v50 }
 0x7d9   :  { %v983_v1 = vpop.permute.xlu1 %982  ;;  %v985_v10 = vpop.permute.xlu0 %984 }
 0x7da   :  { %v995_v13 = vsel %vm2396_vm5, %v979_v7, %v985_v10  ;;  %v994_v53 = vsel %vm2408_vm6, %v978_v31, %v983_v1  ;;  %vm3100_vm5 = vmmov %vm3097_vm0  ;;  %vm3101_vm6 = vcmask 113664   ;;  %vm3112_vm0 = vcmask 64512  }
 0x7db   :  { %1016 = vrot.lane.b32.xlu1 %v995_v13, %s2191_s14  ;;  %1004 = vrot.lane.b32.xlu0 %v995_v13, %s2192_s15  ;;  %vm3114_vm1 = vmmov %vm3112_vm0 }
 0x7dd   :  { %v961_v37 = vpop.permute.xlu1 %960  ;;  %v987_v60 = vpop.permute.xlu0 %986 }
 0x7de   :  { %v996_v61 = vsel %vm2412_vm7, %v980_v22, %v987_v60  ;;  %vm3102_vm7 = vmmov %vm3101_vm6 }
 0x7df   :  { %1002 = vrot.lane.b32.xlu0 %v994_v53, %s2192_s15  ;;  %1006 = vrot.lane.b32.xlu1 %v996_v61, %s2192_s15 }
 0x7e1   :  { %v973_v21 = vpop.permute.xlu0 %972  ;;  %v989_v54 = vpop.permute.xlu1 %988 }
 0x7e2   :  { %v981_v39 = vsel %vm3100_vm5, %v961_v37, %v973_v21  ;;  %vm3115_vm5 = vmmov %vm3112_vm0 }
 0x7e3   :  { %1014 = vrot.lane.b32.xlu0 %v994_v53, %s2191_s14  ;;  %1018 = vrot.lane.b32.xlu1 %v996_v61, %s2191_s14  ;;  %v997_v40 = vsel %vm2432_vm8, %v981_v39, %v989_v54  ;;  %vm3103_vm8 = vmmov %vm3101_vm6 }
 0x7e7   :  { %1020 = vrot.lane.b32.xlu1 %v997_v40, %s2191_s14  ;;  %1008 = vrot.lane.b32.xlu0 %v997_v40, %s2192_s15 }
 0x84d   :  { %v1017_v34 = vpop.permute.xlu1 %1016  ;;  %v1005_v35 = vpop.permute.xlu0 %1004 }
 0x84e   :  { %v1027_v24 = vsel %vm3101_vm6, %v1005_v35, %v1017_v34 }
 0x84f   :  { %v1031_v33 = vsel %vm2441_vm10, %v1027_v24, %v995_v13  ;;  %vm3104_vm10 = vmmov %vm3101_vm6  ;;  %vm3116_vm6 = vnez %v3068_v63 }
 0x850   :  { %1052 = vrot.lane.b32.xlu1 %v1031_v33, %s2193_s16  ;;  %1040 = vrot.lane.b32.xlu0 %v1031_v33, %s2194_s17 }
 0x851   :  { %v1007_v51 = vpop.permute.xlu1 %1006  ;;  %v1003_v62 = vpop.permute.xlu0 %1002 }
 0x855   :  { %v1019_v4 = vpop.permute.xlu1 %1018  ;;  %v1015_v49 = vpop.permute.xlu0 %1014 }
 0x856   :  { %v1028_v55 = vsel %vm3102_vm7, %v1007_v51, %v1019_v4  ;;  %v1026_v56 = vsel %vm3103_vm8, %v1003_v62, %v1015_v49  ;;  %vm3117_vm7 = vcmask 1046528   ;;  %vm3118_vm8 = vmmov %vm3112_vm0 }
 0x857   :  { %v1032_v12 = vsel %vm2452_vm11, %v1028_v55, %v996_v61  ;;  %v1030_v32 = vsel %vm2456_vm12, %v1026_v56, %v994_v53  ;;  %vm3105_vm11 = vcmask 97280  }
 0x858   :  { %1042 = vrot.lane.b32.xlu1 %v1032_v12, %s2194_s17  ;;  %1038 = vrot.lane.b32.xlu0 %v1030_v32, %s2194_s17  ;;  %vm3106_vm12 = vmmov %vm3105_vm11 }
 0x859   :  { %v1021_v52 = vpop.permute.xlu1 %1020  ;;  %v1009_v48 = vpop.permute.xlu0 %1008 }
 0x85a   :  { %v1029_v59 = vsel %vm3104_vm10, %v1009_v48, %v1021_v52  ;;  %vm3119_vm10 = vcmp.eq.s32.totalorder %v2530_v0, 1 }
 0x85b   :  { %v1033_v2 = vsel %vm2472_vm13, %v1029_v59, %v997_v40  ;;  %vm3107_vm13 = vmmov %vm3105_vm11 }
 0x85c   :  { %1054 = vrot.lane.b32.xlu1 %v1032_v12, %s2193_s16  ;;  %1050 = vrot.lane.b32.xlu0 %v1030_v32, %s2193_s16 }
 0x860   :  { %1056 = vrot.lane.b32.xlu1 %v1033_v2, %s2193_s16  ;;  %1044 = vrot.lane.b32.xlu0 %v1033_v2, %s2194_s17 }
 0x8c2   :  { %v1053_v18 = vpop.permute.xlu1 %1052  ;;  %v1041_v19 = vpop.permute.xlu0 %1040 }
 0x8c3   :  { %v1063_v5 = vsel %vm3105_vm11, %v1041_v19, %v1053_v18 }
 0x8c4   :  { %v1067_v6 = vsel %vm2481_vm15, %v1063_v5, %v1031_v33  ;;  %vm3110_vm15 = vmmov %vm3105_vm11 }
 0x8c5   :  { %1088 = vrot.lane.b32.xlu1 %v1067_v6, %s2195_s18  ;;  %1076 = vrot.lane.b32.xlu0 %v1067_v6, %s2196_s19  ;;  %vm3120_vm11 = vmmov %vm3117_vm7 }
 0x8ca   :  { %v1043_v7 = vpop.permute.xlu1 %1042  ;;  %v1039_v1 = vpop.permute.xlu0 %1038 }
 0x8ce   :  { %v1055_v10 = vpop.permute.xlu1 %1054  ;;  %v1051_v44 = vpop.permute.xlu0 %1050 }
 0x8cf   :  { %v1064_v13 = vsel %vm3106_vm12, %v1043_v7, %v1055_v10  ;;  %v1062_v22 = vsel %vm3107_vm13, %v1039_v1, %v1051_v44  ;;  %vm3121_vm12 = vcmp.le.s32.totalorder %v2530_v0, 0  ;;  %vm3122_vm13 = vcmp.eq.s32.totalorder %v2541_v15, 1 }
 0x8d0   :  { %v1068_v31 = vsel %vm3108_vm14, %v1064_v13, %v1032_v12  ;;  %v1066_v37 = vsel %vm3109_vm9, %v1062_v22, %v1030_v32  ;;  %vm3123_vm14 = vcmp.le.s32.totalorder %v2541_v15, 0  ;;  %vm3124_vm9 = vmmov %vm3117_vm7 }
 0x8d1   :  { %1078 = vrot.lane.b32.xlu1 %v1068_v31, %s2196_s19  ;;  %1074 = vrot.lane.b32.xlu0 %v1066_v37, %s2196_s19 }
 0x8d2   :  { %v1057_v45 = vpop.permute.xlu1 %1056  ;;  %v1045_v60 = vpop.permute.xlu0 %1044 }
 0x8d3   :  { %v1065_v53 = vsel %vm3110_vm15, %v1045_v60, %v1057_v45  ;;  %vm3125_vm15 = vmmov %vm3117_vm7 }
 0x8d4   :  { %v1069_v61 = vsel %vm3111_vm2, %v1065_v53, %v1033_v2  ;;  %vm3127_vm2 = vcmp.eq.s32.totalorder %v2558_v30, 1 }
 0x8d5   :  { %1090 = vrot.lane.b32.xlu1 %v1068_v31, %s2195_s18  ;;  %1086 = vrot.lane.b32.xlu0 %v1066_v37, %s2195_s18 }
 0x8d9   :  { %1092 = vrot.lane.b32.xlu1 %v1069_v61, %s2195_s18  ;;  %1080 = vrot.lane.b32.xlu0 %v1069_v61, %s2196_s19  ;;  %s2201_s19 = smov 32  }
 0x937   :  { %v1089_v8 = vpop.permute.xlu1 %1088  ;;  %v1077_v9 = vpop.permute.xlu0 %1076 }
 0x938   :  { %v1099_v21 = vsel %vm3112_vm0, %v1077_v9, %v1089_v8  ;;  %vm3128_vm0 = vcmp.le.s32.totalorder %v2566_v47, 0 }
 0x939   :  { %v1103_v40 = vsel %vm3113_vm3, %v1099_v21, %v1067_v6  ;;  %vm3129_vm3 = vcmp.le.s32.totalorder %v2558_v30, 0 }
 0x93a   :  { %v1111_v33 = vrot.slane %v1103_v40, 1 }
 0x943   :  { %v1079_v54 = vpop.permute.xlu1 %1078  ;;  %v1075_v39 = vpop.permute.xlu0 %1074 }
 0x947   :  { %v1091_v34 = vpop.permute.xlu1 %1090  ;;  %v1087_v35 = vpop.permute.xlu0 %1086 }
 0x948   :  { %v1100_v24 = vsel %vm3114_vm1, %v1079_v54, %v1091_v34  ;;  %v1098_v41 = vsel %vm3115_vm5, %v1075_v39, %v1087_v35  ;;  %vm3130_vm1 = vcmask 130048  }
 0x949   :  { %v1104_v51 = vsel %vm3116_vm6, %v1100_v24, %v1068_v31  ;;  %v1110_v62 = vrot.slane %v1098_v41, 1  ;;  %vm3131_vm5 = vmmov %vm3130_vm1 }
 0x94a   :  { %v1113_v4 = vrot.slane %v1104_v51, 1  ;;  %vm3132_vm6 = vmmov %vm3130_vm1 }
 0x94b   :  { %v1093_v49 = vpop.permute.xlu1 %1092  ;;  %v1081_v55 = vpop.permute.xlu0 %1080  ;;  %v1112_v56 = vsel %vm3117_vm7, %v1110_v62, %v1111_v33  ;;  %vm3133_vm7 = vmmov %vm3130_vm1 }
 0x94c   :  { %v1101_v12 = vsel %vm3118_vm8, %v1081_v55, %v1093_v49  ;;  %v1123_v50 = vsel %vm3119_vm10, 0.0, %v1112_v56  ;;  %v1114_v32 = vsel %vm3120_vm11, %v1111_v33, %v1113_v4  ;;  %vm3134_vm8 = vcmask 261120  }
 0x94d   :  { %v1105_v52 = vsel %vm2548_vm4, %v1101_v12, %v1069_v61  ;;  %v1127_v63 = vsel %vm3121_vm12, %v1098_v41, %v1123_v50  ;;  %v1124_v48 = vsel %vm3122_vm13, 0.0, %v1114_v32  ;;  %vm3126_vm4 = vcmp.eq.s32.totalorder %v2566_v47, 1  ;;  %vm3135_vm10 = vmmov %vm3134_vm8 }
 0x94e   :  { %v1115_v59 = vrot.slane %v1105_v52, 1  ;;  %1135 = vrot.lane.b32.xlu0 %v1127_v63, %s2197_s20  ;;  %v1128_v2 = vsel %vm3123_vm14, %v1103_v40, %v1124_v48  ;;  %vm3136_vm11 = vmmov %vm3134_vm8 }
 0x94f   :  { %1137 = vrot.lane.b32.xlu1 %v1128_v2, %s2197_s20  ;;  %vm3137_vm12 = vmmov %vm3134_vm8 }
 0x950   :  { %v1122_v18 = vsel %vm3124_vm9, %v1115_v59, %v1110_v62  ;;  %v1116_v19 = vsel %vm3125_vm15, %v1113_v4, %v1115_v59  ;;  %vm3138_vm13 = vmmov %vm3134_vm8 }
 0x951   :  { %v1126_v36 = vsel %vm3126_vm4, 0.0, %v1122_v18  ;;  %v1125_v0 = vsel %vm3127_vm2, 0.0, %v1116_v19  ;;  %vm3139_vm14 = vmmov %vm3134_vm8 }
 0x952   :  { %v1130_v5 = vsel %vm3128_vm0, %v1105_v52, %v1126_v36  ;;  %v1129_v6 = vsel %vm3129_vm3, %v1104_v51, %v1125_v0  ;;  %vm3140_vm9 = vmmov %vm3134_vm8 }
 0x953   :  { %1141 = vrot.lane.b32.xlu1 %v1130_v5, %s2197_s20  ;;  %1139 = vrot.lane.b32.xlu0 %v1129_v6, %s2197_s20  ;;  %vm3141_vm15 = vmmov %vm3134_vm8 }
 0x954   :  { %vm3142_vm4 = vmmov %vm3134_vm8 }
 0x955   :  { %vm3143_vm2 = vmmov %vm3142_vm4 }
 0x956   :  { %vm3144_vm0 = vmmov %vm3143_vm2 }
 0x957   :  { %vm3145_vm3 = vmmov %vm3144_vm0 }
 0x9c0   :  { %v1136_v15 = vpop.permute.xlu0 %1135 }
 0x9c1   :  { %v1147_v7 = vsel %vm3130_vm1, %v1127_v63, %v1136_v15  ;;  %v1138_v1 = vpop.permute.xlu1 %1137 }
 0x9c2   :  { %v1151_v10 = vadd.f32 %v1147_v7, %v2696_v42  ;;  %v1148_v44 = vsel %vm3131_vm5, %v1128_v2, %v1138_v1  ;;  %v2845_v1 = vld [vmem:[%s3018_s2 + $0x18] sm:$0xff]  ;;  %vm3146_vm5 = vmmov %vm3130_vm1 }
 0x9c3   :  { %v1152_v13 = vadd.f32 %v1148_v44, %v2698_v16  ;;  %v2859_v44 = vld [vmem:[%s3018_s2 + $0x8] sm:$0xff] }
 0x9c4   :  { %v1155_v22 = vmul.f32 0.25, %v1151_v10  ;;  %v2850_v10 = vld [vmem:[%s3018_s2 + $0x10] sm:$0xff] }
 0x9c5   :  { %v1156_v47 = vmul.f32 0.25, %v1152_v13  ;;  %v1142_v31 = vpop.permute.xlu1 %1141  ;;  %v1140_v37 = vpop.permute.xlu0 %1139  ;;  %v2866_v13 = vld [vmem:[%s3018_s2] sm:$0xff] }
 0x9c6   :  { %v1150_v30 = vsel %vm3132_vm6, %v1130_v5, %v1142_v31  ;;  %v1149_v45 = vsel %vm3133_vm7, %v1129_v6, %v1140_v37  ;;  %v1159_v60 = vadd.f32 %v1155_v22, %v2616_v23  ;;  %vm3147_vm6 = vmmov %vm3144_vm0 }
 0x9c7   :  { %v1154_v53 = vadd.f32 %v1150_v30, %v2700_v25  ;;  %v1153_v61 = vadd.f32 %v1149_v45, %v2702_v38  ;;  %v1160_v42 = vadd.f32 %v1156_v47, %v2618_v14  ;;  %v2877_v30 = vld [vmem:[%s3017_s3] sm:$0xff]  ;;  %vm3148_vm7 = vmmov %vm3144_vm0 }
 0x9c8   :  { %v1163_v8 = vsel %vm3134_vm8, %v1159_v60, -inf  ;;  %v2881_v45 = vrot.slane %v2877_v30, %v2347_v46  ;;  %vm3149_vm8 = vmmov %vm3130_vm1 }
 0x9c9   :  { %v1158_v9 = vmul.f32 0.25, %v1154_v53  ;;  %v1157_v16 = vmul.f32 0.25, %v1153_v61  ;;  %1164 = vmax.xlane.f32.xlu0 %v1163_v8  ;;  %v1166_v21 = vsel %vm3135_vm10, %v1160_v42, -inf  ;;  %vm3150_vm10 = vmmov %vm3130_vm1 }
 0x9ca   :  { %1167 = vmax.xlane.f32.xlu1 %v1166_v21 }
 0x9cb   :  { %v1161_v54 = vadd.f32 %v1157_v16, %v2628_v43  ;;  %v1162_v23 = vadd.f32 %v1158_v9, %v2630_v58 }
 0x9cd   :  { %v1169_v39 = vsel %vm3136_vm11, %v1161_v54, -inf  ;;  %v1172_v25 = vsel %vm3137_vm12, %v1162_v23, -inf  ;;  %vm3151_vm11 = vmmov %vm3144_vm0 }
 0x9ce   :  { %1170 = vmax.xlane.f32.xlu0 %v1169_v39  ;;  %vm3152_vm12 = vmmov %vm3144_vm0  ;;  %v2181_v39 = vld [vmem:[%s3016_s0 + $0x8] sm:$0xff] }
 0x9d2   :  { %1173 = vmax.xlane.f32.xlu0 %v1172_v25 }
 0x9db   :  { %1213 = vrot.lane.b32.xlu1 %v2292_v26, %s2200_s23 }
 0xa52   :  { %v1165_v14 = vpop.xlane.xlu0 %1164 }
 0xa53   :  { %v1175_v38 = vsub.f32 %v1159_v60, %v1165_v14  ;;  %v1168_v40 = vpop.xlane.xlu1 %1167 }
 0xa54   :  { %v1176_v34 = vsub.f32 %v1160_v42, %v1168_v40 }
 0xa55   :  { %v1179_v35 = vmul.f32 1.442695, %v1175_v38 }
 0xa56   :  { %v1181_v24 = vmul.f32 1.442695, %v1176_v34 }
 0xa57   :  { %2148 = vpow2.f32 %v1179_v35  ;;  %v1214_v43 = vpop.permute.xlu1 %1213  ;;  %v1171_v41 = vpop.xlane.xlu0 %1170 }
 0xa58   :  { %2150 = vpow2.f32 %v1181_v24  ;;  %v1177_v33 = vsub.f32 %v1161_v54, %v1171_v41  ;;  %2051 = vmatprep.subr.mxu1 %v1214_v43  ;;  %v2183_v24 = vld [vmem:[%s3016_s0 + $0x18] sm:$0xff] }
 0xa59   :  { %2052 = vmatpush3.msra.mxu1 %v1214_v43 }
 0xa5a   :  { %v1183_v58 = vmul.f32 1.442695, %v1177_v33  ;;  %v2184_v33 = vld [vmem:[%s3016_s0 + $0x10] sm:$0xff] }
 0xa5b   :  { %v1174_v51 = vpop.xlane.xlu0 %1173 }
 0xa5c   :  { %2152 = vpow2.f32 %v1183_v58  ;;  %v1178_v62 = vsub.f32 %v1162_v23, %v1174_v51 }
 0xa5e   :  { %v1185_v4 = vmul.f32 1.442695, %v1178_v62 }
 0xa60   :  { %2154 = vpow2.f32 %v1185_v4 }
 0xa64   :  { %v2149_v26 = vpop.eup %2148 }
 0xa65   :  { %v2151_v49 = vpop.eup %2150  ;;  %v1187_v55 = vsel %vm3138_vm13, %v2149_v26, 0.0  ;;  %vm3153_vm13 = vmmov %vm3144_vm0 }
 0xa66   :  { %1188 = vadd.xlane.f32.xlu1 %v1187_v55  ;;  %v1190_v56 = vsel %vm3139_vm14, %v2151_v49, 0.0  ;;  %vm3154_vm14 = vmmov %vm3144_vm0 }
 0xa67   :  { %1191 = vadd.xlane.f32.xlu0 %v1190_v56 }
 0xa69   :  { %v2153_v12 = vpop.eup %2152 }
 0xa6a   :  { %v1193_v50 = vsel %vm3140_vm9, %v2153_v12, 0.0  ;;  %vm3155_vm9 = vmmov %vm3144_vm0 }
 0xa6b   :  { %1194 = vadd.xlane.f32.xlu1 %v1193_v50 }
 0xa6d   :  { %v2155_v32 = vpop.eup %2154 }
 0xa6e   :  { %v1196_v52 = vsel %vm3141_vm15, %v2155_v32, 0.0  ;;  %vm3156_vm15 = vmmov %vm3144_vm0 }
 0xa6f   :  { %1197 = vadd.xlane.f32.xlu0 %v1196_v52 }
 0xa7c   :  { %1209 = vrot.lane.b32.xlu1 %v2296_v27, %s2200_s23 }
 0xa80   :  { %1207 = vrot.lane.b32.xlu1 %v2285_v17, %s2200_s23 }
 0xa85   :  { %1211 = vrot.lane.b32.xlu0 %v2287_v20, %s2200_s23 }
 0xaef   :  { %v1189_v63 = vpop.xlane.xlu1 %1188 }
 0xaf0   :  { %2156 = vrcp.f32 %v1189_v63  ;;  %v1192_v48 = vpop.xlane.xlu0 %1191 }
 0xaf1   :  { %2158 = vrcp.f32 %v1192_v48 }
 0xaf4   :  { %v1195_v59 = vpop.xlane.xlu1 %1194 }
 0xaf5   :  { %2160 = vrcp.f32 %v1195_v59 }
 0xaf8   :  { %v1198_v2 = vpop.xlane.xlu0 %1197  ;;  %v1210_v18 = vpop.permute.xlu1 %1209 }
 0xaf9   :  { %2162 = vrcp.f32 %v1198_v2 }
 0xafc   :  { %v1212_v19 = vpop.permute.xlu0 %1211  ;;  %v1208_v17 = vpop.permute.xlu1 %1207 }
 0xafd   :  { %v2157_v36 = vpop.eup %2156  ;;  %2053 = vmatprep.subr.mxu1 %v1212_v19 }
 0xafe   :  { %v2159_v0 = vpop.eup %2158  ;;  %2054 = vmatpush3.msra.mxu1 %v1212_v19  ;;  %v1203_v27 = vmul.f32 %v2157_v36, %v2149_v26 }
 0xaff   :  { %2055 = vmatprep.subr.mxu1 %v1210_v18  ;;  %v1204_v20 = vmul.f32 %v2159_v0, %v2151_v49 }
 0xb00   :  { %2056 = vmatpush3.msra.mxu1 %v1210_v18  ;;  %2059 = vmatprep.mubr.msk.f32.mxu1 %vm3142_vm4, %v1203_v27  ;;  %vm3157_vm4 = vmmov %vm3144_vm0 }
 0xb01   :  { %2057 = vmatprep.subr.mxu1 %v1208_v17 }
 0xb02   :  { %v2161_v5 = vpop.eup %2160  ;;  %2058 = vmatpush3.msra.mxu1 %v1208_v17 }
 0xb03   :  { %2060 = vmatmul.mubr.msk.f32.vlgmr.msra.gmra.mxu1 %vm3143_vm2, %v1204_v20  ;;  %v1205_v6 = vmul.f32 %v2161_v5, %v2153_v12  ;;  %2065 = vmatprep.subr.mxu1 %v2845_v1  ;;  %vm3158_vm2 = vmmov %vm3144_vm0 }
 0xb04   :  { %2066 = vmatpush3.msra.mxu1 %v2845_v1 }
 0xb05   :  { %2062 = vmatprep.mubr.msk.f32.mxu1 %vm3144_vm0, %v1205_v6  ;;  %2067 = vmatprep.subr.mxu1 %v2850_v10 }
 0xb06   :  { %v2163_v15 = vpop.eup %2162  ;;  %2068 = vmatpush3.msra.mxu1 %v2850_v10 }
 0xb07   :  { %v1206_v7 = vmul.f32 %v2163_v15, %v2155_v32  ;;  %2069 = vmatprep.subr.mxu1 %v2859_v44 }
 0xb08   :  { %2070 = vmatpush3.msra.mxu1 %v2859_v44 }
 0xb09   :  { %2063 = vmatmul.mubr.msk.f32.gmra.mxu1 %vm3145_vm3, %v1206_v7  ;;  %2071 = vmatprep.subr.mxu1 %v2866_v13  ;;  %vm3159_vm3 = vmmov %vm3144_vm0  ;;  %v1500_v7 = vsub.s32 2, %v2276_v11 }
 0xb0a   :  { %2072 = vmatpush3.msra.mxu1 %v2866_v13 }
 0xbc3   :  { %v2061_v22 = vpop.f32.mrf.mxu1 }
 0xbc4   :  { %1322 = vrot.lane.b32.xlu1 %v2061_v22, %s2197_s20  ;;  %v2943_v22 = vrot.slane %v2877_v30, %v1500_v7 }
 0xbc5   :  { %v1297_v47 = vpop.f32.mrf.mxu1 }
 0xbc6   :  { %1320 = vrot.lane.b32.xlu0 %v1297_v47, %s2197_s20  ;;  %v34_v47 = vld [vmem:[%s3018_s2 + $0x38] sm:$0xff] }
 0xbc9   :  { %v2064_v31 = vpop.f32.mrf.mxu1 }
 0xbca   :  { %1326 = vrot.lane.b32.xlu1 %v2064_v31, %s2197_s20  ;;  %v33_v31 = vld [vmem:[%s3018_s2 + $0x30] sm:$0xff] }
 0xbcb   :  { %v1307_v37 = vpop.f32.mrf.mxu1 }
 0xbcc   :  { %1324 = vrot.lane.b32.xlu0 %v1307_v37, %s2197_s20  ;;  %v32_v37 = vld [vmem:[%s3018_s2 + $0x28] sm:$0xff] }
 0xbd0   :  { %1341 = vrot.lane.b32.xlu0 %v2881_v45, %s2185_s10 }
 0xc36   :  { %v1323_v60 = vpop.permute.xlu1 %1322 }
 0xc37   :  { %v1333_v42 = vsel %vm3146_vm5, %v2686_v3, %v1323_v60  ;;  %v31_v60 = vld [vmem:[%s3018_s2 + $0x20] sm:$0xff]  ;;  %vm3161_vm5 = vmmov %vm3144_vm0 }
 0xc38   :  { %v1321_v53 = vpop.permute.xlu0 %1320 }
 0xc39   :  { %v1332_v61 = vsel %vm3130_vm1, %v2688_v29, %v1321_v53  ;;  %vm3160_vm1 = vmmov %vm3144_vm0 }
 0xc3a   :  { %2073 = vmatprep.mubr.msk.f32.mxu1 %vm3147_vm6, %v1332_v61  ;;  %vm3162_vm6 = vmmov %vm3144_vm0 }
 0xc3b   :  { %2074 = vmatmul.mubr.msk.f32.vlgmr.msra.gmra.mxu1 %vm3148_vm7, %v1333_v42  ;;  %vm3163_vm7 = vmmov %vm3144_vm0 }
 0xc3c   :  { %v1327_v8 = vpop.permute.xlu1 %1326 }
 0xc3d   :  { %v1335_v16 = vsel %vm3150_vm10, %v2690_v57, %v1327_v8  ;;  %vm3164_vm10 = vmmov %vm3144_vm0 }
 0xc3e   :  { %v1325_v9 = vpop.permute.xlu0 %1324 }
 0xc3f   :  { %v1334_v46 = vsel %vm3149_vm8, %v2692_v28, %v1325_v9  ;;  %v2182_v28 = vld [vmem:[%s3016_s0] sm:$0xff]  ;;  %vm1666_vm8 = vcmask 523264  }
 0xc40   :  { %2076 = vmatprep.mubr.msk.f32.mxu1 %vm3151_vm11, %v1334_v46  ;;  %vm3165_vm11 = vmmov %vm3144_vm0 }
 0xc41   :  { %2077 = vmatmul.mubr.msk.f32.gmra.mxu1 %vm3152_vm12, %v1335_v16  ;;  %vm3166_vm12 = vmmov %vm3144_vm0 }
 0xc42   :  { %v1342_v29 = vpop.permute.xlu0 %1341 }
 0xcfb   :  { %v2075_v21 = vpop.f32.mrf.mxu1 }
 0xcfc   :  { %v1428_v54 = vadd.f32 %v2075_v21, %v1342_v29 }
 0xcfd   :  { %v1422_v3 = vpop.f32.mrf.mxu1 }
 0xcfe   :  { %v1442_v23 = vadd.f32 %v2181_v39, %v1428_v54  ;;  %v1423_v25 = vadd.f32 %v1422_v3, %v1342_v29 }
 0xd00   :  { %v1441_v14 = vadd.f32 %v2182_v28, %v1423_v25  ;;  %v1448_v57 = vsel %vm3153_vm13, %v1442_v23, 0.0  ;;  %vm3167_vm13 = vmmov %vm3144_vm0 }
 0xd01   :  { %1449 = vadd.xlane.f32.xlu0 %v1448_v57  ;;  %v2078_v38 = vpop.f32.mrf.mxu1 }
 0xd02   :  { %v1438_v40 = vadd.f32 %v2078_v38, %v1342_v29  ;;  %v1445_v34 = vsel %vm3154_vm14, %v1441_v14, 0.0  ;;  %vm3168_vm14 = vmmov %vm3144_vm0 }
 0xd03   :  { %v1432_v35 = vpop.f32.mrf.mxu1  ;;  %1446 = vadd.xlane.f32.xlu1 %v1445_v34 }
 0xd04   :  { %v1444_v43 = vadd.f32 %v2183_v24, %v1438_v40  ;;  %v1433_v41 = vadd.f32 %v1432_v35, %v1342_v29 }
 0xd06   :  { %v1443_v58 = vadd.f32 %v2184_v33, %v1433_v41  ;;  %v1454_v51 = vsel %vm3155_vm9, %v1444_v43, 0.0  ;;  %vm3169_vm9 = vmmov %vm3144_vm0 }
 0xd07   :  { %1455 = vadd.xlane.f32.xlu1 %v1454_v51 }
 0xd08   :  { %v1451_v62 = vsel %vm3156_vm15, %v1443_v58, 0.0  ;;  %vm3170_vm15 = vmmov %vm3144_vm0 }
 0xd09   :  { %1452 = vadd.xlane.f32.xlu0 %v1451_v62 }
 0xd18   :  { %1526 = vrot.lane.b32.xlu1 %v2850_v10, %s2187_s11 }
 0xd1c   :  { %1524 = vrot.lane.b32.xlu1 %v2859_v44, %s2187_s11 }
 0xd1f   :  { %1528 = vrot.lane.b32.xlu0 %v2845_v1, %s2187_s11 }
 0xd8a   :  { %v1450_v4 = vpop.xlane.xlu0 %1449 }
 0xd8b   :  { %v1459_v26 = vmul.f32 0.03125, %v1450_v4 }
 0xd8c   :  { %v1447_v49 = vpop.xlane.xlu1 %1446 }
 0xd8d   :  { %v2919_v55 = vsub.f32 %v1442_v23, %v1459_v26  ;;  %v1458_v56 = vmul.f32 0.03125, %v1447_v49 }
 0xd8f   :  { %v2921_v12 = vsub.f32 %v1441_v14, %v1458_v56  ;;  %v1467_v50 = vmul.f32 %v2919_v55, %v2919_v55 }
 0xd90   :  { %v1456_v32 = vpop.xlane.xlu1 %1455 }
 0xd91   :  { %v1461_v52 = vmul.f32 0.03125, %v1456_v32  ;;  %v1473_v63 = vsel %vm3157_vm4, %v1467_v50, 0.0  ;;  %v1466_v48 = vmul.f32 %v2921_v12, %v2921_v12  ;;  %vm3171_vm4 = vmmov %vm3144_vm0 }
 0xd92   :  { %v1453_v59 = vpop.xlane.xlu0 %1452  ;;  %1474 = vadd.xlane.f32.xlu1 %v1473_v63 }
 0xd93   :  { %v2928_v2 = vsub.f32 %v1444_v43, %v1461_v52  ;;  %v1460_v18 = vmul.f32 0.03125, %v1453_v59  ;;  %v1470_v19 = vsel %vm3158_vm2, %v1466_v48, 0.0  ;;  %vm3172_vm2 = vmmov %vm3144_vm0 }
 0xd94   :  { %1471 = vadd.xlane.f32.xlu0 %v1470_v19  ;;  %v1527_v36 = vpop.permute.xlu1 %1526 }
 0xd95   :  { %v2931_v0 = vsub.f32 %v1443_v58, %v1460_v18  ;;  %v1469_v27 = vmul.f32 %v2928_v2, %v2928_v2 }
 0xd96   :  { %v1529_v17 = vpop.permute.xlu0 %1528 }
 0xd97   :  { %v1479_v20 = vsel %vm3144_vm0, %v1469_v27, 0.0  ;;  %v1468_v5 = vmul.f32 %v2931_v0, %v2931_v0  ;;  %2079 = vmatprep.subr.mxu1 %v1529_v17 }
 0xd98   :  { %1480 = vadd.xlane.f32.xlu1 %v1479_v20  ;;  %2080 = vmatpush3.msra.mxu1 %v1529_v17  ;;  %v1525_v6 = vpop.permute.xlu1 %1524 }
 0xd99   :  { %v1476_v15 = vsel %vm3159_vm3, %v1468_v5, 0.0  ;;  %2081 = vmatprep.subr.mxu1 %v1527_v36  ;;  %vm3173_vm3 = vmmov %vm3144_vm0 }
 0xd9a   :  { %1477 = vadd.xlane.f32.xlu0 %v1476_v15  ;;  %2082 = vmatpush3.msra.mxu1 %v1527_v36 }
 0xd9b   :  { %2083 = vmatprep.subr.mxu1 %v1525_v6 }
 0xd9c   :  { %2084 = vmatpush3.msra.mxu1 %v1525_v6 }
 0xda9   :  { %1522 = vrot.lane.b32.xlu1 %v2866_v13, %s2187_s11 }
 0xdad   :  { %1651 = vrot.lane.b32.xlu1 %v33_v31, %s2201_s19 }
 0xdb0   :  { %1507 = vrot.lane.b32.xlu0 %v2943_v22, %s2187_s11 }
 0xdb1   :  { %1647 = vrot.lane.b32.xlu1 %v31_v60, %s2201_s19 }
 0xdb4   :  { %1653 = vrot.lane.b32.xlu0 %v34_v47, %s2201_s19 }
 0xdb5   :  { %1643 = vrot.lane.b32.xlu1 %v2850_v10, %s2201_s19 }
 0xdb8   :  { %1649 = vrot.lane.b32.xlu0 %v32_v37, %s2201_s19 }
 0xdb9   :  { %1639 = vrot.lane.b32.xlu1 %v2866_v13, %s2201_s19 }
 0xdbc   :  { %1645 = vrot.lane.b32.xlu0 %v2845_v1, %s2201_s19 }
 0xdc0   :  { %1641 = vrot.lane.b32.xlu0 %v2859_v44, %s2201_s19 }
 0xdc4   :  { %1663 = vrot.lane.b32.xlu0 %v2881_v45, %s2201_s19 }
 0xe1b   :  { %v1475_v53 = vpop.xlane.xlu1 %1474 }
 0xe1c   :  { %v1483_v61 = vmul.f32 0.03125, %v1475_v53 }
 0xe1d   :  { %v1472_v42 = vpop.xlane.xlu0 %1471 }
 0xe1e   :  { %v1487_v8 = vadd.f32 1e-05, %v1483_v61  ;;  %v1482_v9 = vmul.f32 0.03125, %v1472_v42 }
 0xe20   :  { %2164 = vrsqrt.f32 %v1487_v8  ;;  %v1486_v46 = vadd.f32 1e-05, %v1482_v9 }
 0xe21   :  { %v1481_v1 = vpop.xlane.xlu1 %1480 }
 0xe22   :  { %2166 = vrsqrt.f32 %v1486_v46  ;;  %v1485_v16 = vmul.f32 0.03125, %v1481_v1 }
 0xe23   :  { %v1478_v10 = vpop.xlane.xlu0 %1477 }
 0xe24   :  { %v1489_v29 = vadd.f32 1e-05, %v1485_v16  ;;  %v1484_v21 = vmul.f32 0.03125, %v1478_v10 }
 0xe25   :  { %v1523_v44 = vpop.permute.xlu1 %1522 }
 0xe26   :  { %2168 = vrsqrt.f32 %v1489_v29  ;;  %v1488_v54 = vadd.f32 1e-05, %v1484_v21  ;;  %2085 = vmatprep.subr.mxu1 %v1523_v44 }
 0xe27   :  { %2086 = vmatpush3.msra.mxu1 %v1523_v44  ;;  %v1508_v13 = vpop.permute.xlu0 %1507 }
 0xe28   :  { %2170 = vrsqrt.f32 %v1488_v54 }
 0xe29   :  { %v1652_v28 = vpop.permute.xlu1 %1651 }
 0xe2b   :  { %v1654_v25 = vpop.permute.xlu0 %1653 }
 0xe2c   :  { %2093 = vmatprep.subr.mxu0 %v1654_v25 }
 0xe2d   :  { %v2165_v45 = vpop.eup %2164  ;;  %2094 = vmatpush3.msra.mxu0 %v1654_v25  ;;  %v1648_v24 = vpop.permute.xlu1 %1647 }
 0xe2e   :  { %v1495_v3 = vmul.f32 %v2165_v45, %v2919_v55  ;;  %2095 = vmatprep.subr.mxu0 %v1652_v28 }
 0xe2f   :  { %v2167_v39 = vpop.eup %2166  ;;  %v1650_v35 = vpop.permute.xlu0 %1649  ;;  %2096 = vmatpush3.msra.mxu0 %v1652_v28 }
 0xe30   :  { %v1494_v23 = vmul.f32 %v2167_v39, %v2921_v12  ;;  %v1503_v14 = vmul.f32 %v2943_v22, %v1495_v3  ;;  %2097 = vmatprep.subr.mxu0 %v1650_v35  ;;  %v1516_v12 = vsub.s32 3, %v2276_v11 }
 0xe31   :  { %2098 = vmatpush3.msra.mxu0 %v1650_v35  ;;  %v1644_v49 = vpop.permute.xlu1 %1643 }
 0xe32   :  { %v1502_v57 = vmul.f32 %v2943_v22, %v1494_v23  ;;  %v1511_v41 = vadd.f32 %v1508_v13, %v1503_v14  ;;  %2099 = vmatprep.subr.mxu0 %v1648_v24  ;;  %v1517_v50 = vrot.slane %v2877_v30, %v1516_v12 }
 0xe33   :  { %v2169_v38 = vpop.eup %2168  ;;  %v1646_v62 = vpop.permute.xlu0 %1645  ;;  %2100 = vmatpush3.msra.mxu0 %v1648_v24 }
 0xe34   :  { %v1497_v40 = vmul.f32 %v2169_v38, %v2928_v2  ;;  %v1510_v34 = vadd.f32 %v1508_v13, %v1502_v57  ;;  %2101 = vmatprep.subr.mxu0 %v1646_v62 }
 0xe35   :  { %v2171_v43 = vpop.eup %2170  ;;  %2102 = vmatpush3.msra.mxu0 %v1646_v62  ;;  %v1640_v56 = vpop.permute.xlu1 %1639 }
 0xe36   :  { %v1496_v33 = vmul.f32 %v2171_v43, %v2931_v0  ;;  %2087 = vmatprep.mubr.msk.f32.mxu1 %vm3160_vm1, %v1510_v34  ;;  %v1505_v58 = vmul.f32 %v2943_v22, %v1497_v40  ;;  %2103 = vmatprep.subr.mxu0 %v1644_v49  ;;  %vm3174_vm1 = vmmov %vm3144_vm0 }
 0xe37   :  { %2088 = vmatmul.mubr.msk.f32.vlgmr.msra.gmra.mxu1 %vm3161_vm5, %v1511_v41  ;;  %v1642_v55 = vpop.permute.xlu0 %1641  ;;  %2104 = vmatpush3.msra.mxu0 %v1644_v49 }
 0xe38   :  { %v1504_v51 = vmul.f32 %v2943_v22, %v1496_v33  ;;  %v1513_v26 = vadd.f32 %v1508_v13, %v1505_v58  ;;  %2105 = vmatprep.subr.mxu0 %v1642_v55 }
 0xe39   :  { %2106 = vmatpush3.msra.mxu0 %v1642_v55 }
 0xe3a   :  { %v1512_v4 = vadd.f32 %v1508_v13, %v1504_v51  ;;  %2107 = vmatprep.subr.mxu0 %v1640_v56 }
 0xe3b   :  { %2108 = vmatpush3.msra.mxu0 %v1640_v56  ;;  %v1664_v11 = vpop.permute.xlu0 %1663 }
 0xe3c   :  { %2090 = vmatprep.mubr.msk.f32.mxu1 %vm3162_vm6, %v1512_v4 }
 0xe3d   :  { %2091 = vmatmul.mubr.msk.f32.gmra.mxu1 %vm3163_vm7, %v1513_v26 }
 0xef7   :  { %v2089_v32 = vpop.f32.mrf.mxu1 }
 0xef8   :  { %v1618_v52 = vadd.f32 %v2089_v32, %v1517_v50 }
 0xef9   :  { %v1612_v63 = vpop.f32.mrf.mxu1 }
 0xefa   :  { %v1613_v48 = vadd.f32 %v1612_v63, %v1517_v50  ;;  %v1632_v2 = vmax.f32 %v1618_v52, 0.0 }
 0xefc   :  { %v1631_v59 = vmax.f32 %v1613_v48, 0.0 }
 0xefd   :  { %v2092_v18 = vpop.f32.mrf.mxu1 }
 0xefe   :  { %2109 = vmatprep.mubr.msk.f32.mxu0 %vm1666_vm8, %v1631_v59  ;;  %v1628_v19 = vadd.f32 %v2092_v18, %v1517_v50 }
 0xeff   :  { %v1622_v36 = vpop.f32.mrf.mxu1  ;;  %2110 = vmatmul.mubr.msk.f32.vlgmr.msra.gmra.mxu0 %vm1666_vm8, %v1632_v2 }
 0xf00   :  { %v1623_v0 = vadd.f32 %v1622_v36, %v1517_v50  ;;  %v1634_v17 = vmax.f32 %v1628_v19, 0.0 }
 0xf02   :  { %v1633_v27 = vmax.f32 %v1623_v0, 0.0 }
 0xf04   :  { %2112 = vmatprep.mubr.msk.f32.mxu0 %vm1666_vm8, %v1633_v27 }
 0xf05   :  { %2113 = vmatmul.mubr.msk.f32.gmra.mxu0 %vm1666_vm8, %v1634_v17 }
 0xfbf   :  { %v2111_v20 = vpop.f32.mrf.mxu0 }
 0xfc0   :  { %v1751_v30 = vadd.f32 %v2111_v20, %v1664_v11 }
 0xfc1   :  { %v1745_v5 = vpop.f32.mrf.mxu0 }
 0xfc2   :  { %v1765_v6 = vadd.f32 %v1751_v30, %v1511_v41  ;;  %v1746_v15 = vadd.f32 %v1745_v5, %v1664_v11 }
 0xfc4   :  { %v1764_v7 = vadd.f32 %v1746_v15, %v1510_v34  ;;  %v1771_v47 = vsel %vm3164_vm10, %v1765_v6, 0.0 }
 0xfc5   :  { %1772 = vadd.xlane.f32.xlu0 %v1771_v47  ;;  %v2114_v31 = vpop.f32.mrf.mxu0 }
 0xfc6   :  { %v1761_v37 = vadd.f32 %v2114_v31, %v1664_v11  ;;  %v1768_v60 = vsel %vm3165_vm11, %v1764_v7, 0.0 }
 0xfc7   :  { %v1755_v53 = vpop.f32.mrf.mxu0  ;;  %1769 = vadd.xlane.f32.xlu1 %v1768_v60 }
 0xfc8   :  { %v1767_v61 = vadd.f32 %v1761_v37, %v1513_v26  ;;  %v1756_v42 = vadd.f32 %v1755_v53, %v1664_v11 }
 0xfca   :  { %v1766_v8 = vadd.f32 %v1756_v42, %v1512_v4  ;;  %v1777_v9 = vsel %vm3166_vm12, %v1767_v61, 0.0 }
 0xfcb   :  { %1778 = vadd.xlane.f32.xlu1 %v1777_v9 }
 0xfcc   :  { %v1774_v46 = vsel %vm3167_vm13, %v1766_v8, 0.0 }
 0xfcd   :  { %1775 = vadd.xlane.f32.xlu0 %v1774_v46 }
0x104e   :  { %v1773_v1 = vpop.xlane.xlu0 %1772 }
0x104f   :  { %v1781_v16 = vmul.f32 0.03125, %v1773_v1 }
0x1050   :  { %v1770_v10 = vpop.xlane.xlu1 %1769 }
0x1051   :  { %v1785_v29 = vsub.f32 %v1765_v6, %v1781_v16  ;;  %v1780_v21 = vmul.f32 0.03125, %v1770_v10 }
0x1053   :  { %v1784_v44 = vsub.f32 %v1764_v7, %v1780_v21  ;;  %v1789_v54 = vmul.f32 %v1785_v29, %v1785_v29 }
0x1054   :  { %v1779_v13 = vpop.xlane.xlu1 %1778 }
0x1055   :  { %v1783_v45 = vmul.f32 0.03125, %v1779_v13  ;;  %v1795_v3 = vsel %vm3168_vm14, %v1789_v54, 0.0  ;;  %v1788_v39 = vmul.f32 %v1784_v44, %v1784_v44 }
0x1056   :  { %v1776_v23 = vpop.xlane.xlu0 %1775  ;;  %1796 = vadd.xlane.f32.xlu1 %v1795_v3 }
0x1057   :  { %v1787_v25 = vsub.f32 %v1767_v61, %v1783_v45  ;;  %v1782_v28 = vmul.f32 0.03125, %v1776_v23  ;;  %v1792_v14 = vsel %vm3169_vm9, %v1788_v39, 0.0 }
0x1058   :  { %1793 = vadd.xlane.f32.xlu0 %v1792_v14 }
0x1059   :  { %v1786_v57 = vsub.f32 %v1766_v8, %v1782_v28  ;;  %v1791_v38 = vmul.f32 %v1787_v25, %v1787_v25 }
0x105b   :  { %v1801_v40 = vsel %vm3170_vm15, %v1791_v38, 0.0  ;;  %v1790_v34 = vmul.f32 %v1786_v57, %v1786_v57 }
0x105c   :  { %1802 = vadd.xlane.f32.xlu1 %v1801_v40 }
0x105d   :  { %v1798_v35 = vsel %vm3171_vm4, %v1790_v34, 0.0 }
0x105e   :  { %1799 = vadd.xlane.f32.xlu0 %v1798_v35 }
0x106d   :  { %1827 = vrot.lane.b32.xlu1 %v2943_v22, %s2201_s19 }
0x1074   :  { %1820 = vrot.lane.b32.xlu0 %v2943_v22, %s2185_s10 }
0x10df   :  { %v1797_v24 = vpop.xlane.xlu1 %1796 }
0x10e0   :  { %v1805_v43 = vmul.f32 0.03125, %v1797_v24 }
0x10e1   :  { %v1794_v41 = vpop.xlane.xlu0 %1793 }
0x10e2   :  { %v1809_v33 = vadd.f32 1e-05, %v1805_v43  ;;  %v1804_v58 = vmul.f32 0.03125, %v1794_v41 }
0x10e4   :  { %2172 = vrsqrt.f32 %v1809_v33  ;;  %v1808_v51 = vadd.f32 1e-05, %v1804_v58 }
0x10e5   :  { %v1803_v62 = vpop.xlane.xlu1 %1802 }
0x10e6   :  { %2174 = vrsqrt.f32 %v1808_v51  ;;  %v1807_v4 = vmul.f32 0.03125, %v1803_v62 }
0x10e7   :  { %v1800_v26 = vpop.xlane.xlu0 %1799 }
0x10e8   :  { %v1811_v49 = vadd.f32 1e-05, %v1807_v4  ;;  %v1806_v55 = vmul.f32 0.03125, %v1800_v26 }
0x10e9   :  { %v1828_v52 = vpop.permute.xlu1 %1827 }
0x10ea   :  { %2176 = vrsqrt.f32 %v1811_v49  ;;  %v1810_v56 = vadd.f32 1e-05, %v1806_v55 }
0x10eb   :  { %v1821_v50 = vpop.permute.xlu0 %1820 }
0x10ec   :  { %2178 = vrsqrt.f32 %v1810_v56 }
0x10f1   :  { %v2173_v12 = vpop.eup %2172 }
0x10f2   :  { %v1817_v32 = vmul.f32 %v2173_v12, %v1785_v29 }
0x10f3   :  { %v2175_v22 = vpop.eup %2174 }
0x10f4   :  { %v1816_v63 = vmul.f32 %v2175_v22, %v1784_v44  ;;  %v1824_v48 = vmul.f32 %v1821_v50, %v1817_v32 }
0x10f6   :  { %v1823_v59 = vmul.f32 %v1821_v50, %v1816_v63  ;;  %v1831_v2 = vadd.f32 %v1828_v52, %v1824_v48 }
0x10f7   :  { %v2177_v18 = vpop.eup %2176 }
0x10f8   :  { %v1819_v19 = vmul.f32 %v2177_v18, %v1787_v25  ;;  %v1830_v36 = vadd.f32 %v1828_v52, %v1823_v59  ;;  %1835 = vst.msk [vmem:[%s3019_s4 + $0x8] sm:$0xff] %vm3172_vm2, %v1831_v2 }
0x10f9   :  { %v2179_v0 = vpop.eup %2178 }
0x10fa   :  { %v1818_v27 = vmul.f32 %v2179_v0, %v1786_v57  ;;  %v1826_v17 = vmul.f32 %v1821_v50, %v1819_v19  ;;  %1834 = vst.msk [vmem:[%s3019_s4] sm:$0xff] %vm3144_vm0, %v1830_v36 }
0x10fc   :  { %v1825_v11 = vmul.f32 %v1821_v50, %v1818_v27  ;;  %v1833_v20 = vadd.f32 %v1828_v52, %v1826_v17 }
0x10fe   :  { %v1832_v30 = vadd.f32 %v1828_v52, %v1825_v11  ;;  %1837 = vst.msk [vmem:[%s3019_s4 + $0x18] sm:$0xff] %vm3173_vm3, %v1833_v20 }
0x1100   :  { %1836 = vst.msk [vmem:[%s3019_s4 + $0x10] sm:$0xff] %vm3174_vm1, %v1832_v30 }

</bundles_post_ra>
